<compile_context>
chip_gen: v7x
topology: tpu7x:2x2x1
jax: 0.10.0
libtpu: 0.0.40
codegen_flags: <defaults>
</compile_context>

<pallas_src>
import math
import functools

import jax
import jax.numpy as jnp
from jax.experimental import pallas as pl
from jax.experimental.pallas import tpu as pltpu


NEG_INF = -1e30      # finite "minus infinity": avoids NaN softmax for fully-masked rows
LN_EPS = 1e-5

# Tile targets: multiples of 256 (v6e/v7x MXU width); at toy sizes _fit_tile degrades to
# the full (small) dim, which also satisfies the (8,128) block constraint.
TM, TN, TK = 256, 256, 512


def _fit_tile(dim, target):
    """Largest clean tile: `target` if it divides `dim`, else the full dim."""
    if dim <= target:
        return dim
    return target if dim % target == 0 else dim


# ----------------------------------------------------------------------------
# Pallas kernels
# ----------------------------------------------------------------------------

def _matmul_kernel(x_ref, w_ref, b_ref, o_ref, acc_ref, *, activation):
    """Tiled matmul with K-reduction into an f32 VMEM accumulator; bias (+relu) epilogue."""
    @pl.when(pl.program_id(2) == 0)
    def _():
        acc_ref[...] = jnp.zeros_like(acc_ref)

    acc_ref[...] += jnp.dot(x_ref[...].astype(jnp.bfloat16), w_ref[...],
                            preferred_element_type=jnp.float32)

    @pl.when(pl.program_id(2) == pl.num_programs(2) - 1)
    def _():
        acc = acc_ref[...] + b_ref[...]
        if activation == "relu":
            acc = jnp.maximum(acc, 0.0)
        o_ref[...] = acc.astype(o_ref.dtype)


def _self_attn_kernel(qkv_ref, mask_ref, kpad_ref, o_ref, *, nhead, scale):
    """One batch element per grid step; heads split/merged in-kernel.

    qkv_ref : (L, 3E) bf16   columns = [Q heads | K heads | V heads], head h at h*dh
    mask_ref: (Lq, Lk) f32   additive attention mask (shared across batch/heads)
    kpad_ref: (1, 1, Lk) f32 key-padding (1.0 = pad) for this batch element
    o_ref   : (L, E)  bf16   heads merged along the lane axis (lane-dense output)
    """
    L, E3 = qkv_ref.shape
    E = E3 // 3
    dh = E // nhead

    qkv = qkv_ref[...].reshape(L, 3 * nhead, dh).transpose(1, 0, 2)   # (3H, L, dh)
    q = qkv[:nhead]
    k = qkv[nhead:2 * nhead]
    v = qkv[2 * nhead:]

    s = jnp.einsum('hqd,hkd->hqk', q, k,
                   preferred_element_type=jnp.float32) * scale        # (H, Lq, Lk) f32
    s = s + mask_ref[...][None, :, :]
    s = jnp.where(kpad_ref[...] > 0.5, NEG_INF, s)                    # broadcast over H, Lq

    m = jnp.max(s, axis=-1, keepdims=True)                            # f32 softmax (v5e-safe)
    p = jnp.exp(s - m)
    p = p * pl.reciprocal(jnp.sum(p, axis=-1, keepdims=True), approx=True)

    o = jnp.einsum('hqk,hkd->hqd', p.astype(jnp.bfloat16), v,
                   preferred_element_type=jnp.float32)                # (H, Lq, dh)
    o_ref[...] = o.transpose(1, 0, 2).reshape(L, E).astype(o_ref.dtype)


def _cross_attn_kernel(q_ref, kv_ref, kpad_ref, o_ref, *, nhead, scale):
    """Cross-attention (memory_mask=None): only key-padding mask, per-batch grid step."""
    T, E = q_ref.shape
    S = kv_ref.shape[0]
    dh = E // nhead

    q = q_ref[...].reshape(T, nhead, dh).transpose(1, 0, 2)           # (H, T, dh)
    kv = kv_ref[...].reshape(S, 2 * nhead, dh).transpose(1, 0, 2)     # (2H, S, dh)
    k = kv[:nhead]
    v = kv[nhead:]

    s = jnp.einsum('hqd,hkd->hqk', q, k,
                   preferred_element_type=jnp.float32) * scale        # (H, T, S)
    s = jnp.where(kpad_ref[...] > 0.5, NEG_INF, s)

    m = jnp.max(s, axis=-1, keepdims=True)
    p = jnp.exp(s - m)
    p = p * pl.reciprocal(jnp.sum(p, axis=-1, keepdims=True), approx=True)

    o = jnp.einsum('hqk,hkd->hqd', p.astype(jnp.bfloat16), v,
                   preferred_element_type=jnp.float32)
    o_ref[...] = o.transpose(1, 0, 2).reshape(T, E).astype(o_ref.dtype)


def _outproj_res_ln_kernel(o_ref, res_ref, wo_ref, bo_ref, g_ref, b_ref, y_ref):
    """Attention out-projection + residual add + LayerNorm, fused, rows-tiled."""
    proj = jnp.dot(o_ref[...], wo_ref[...],
                   preferred_element_type=jnp.float32) + bo_ref[...]
    x = res_ref[...] + proj                                           # residual in f32
    mu = jnp.mean(x, axis=-1, keepdims=True)
    var = jnp.mean(jnp.square(x - mu), axis=-1, keepdims=True)
    xn = (x - mu) * jax.lax.rsqrt(var + LN_EPS)
    y_ref[...] = (xn * g_ref[...] + b_ref[...]).astype(y_ref.dtype)


def _ffn_res_ln_kernel(x_ref, w1_ref, b1_ref, w2_ref, b2_ref, g_ref, b_ref, y_ref):
    """lin1 + relu + lin2 + residual + LayerNorm, fused; (rows, FF) stays on-chip."""
    x = x_ref[...]
    h = jnp.dot(x.astype(jnp.bfloat16), w1_ref[...],
                preferred_element_type=jnp.float32) + b1_ref[...]
    h = jnp.maximum(h, 0.0)
    f = jnp.dot(h.astype(jnp.bfloat16), w2_ref[...],
                preferred_element_type=jnp.float32) + b2_ref[...]
    x = x + f
    mu = jnp.mean(x, axis=-1, keepdims=True)
    var = jnp.mean(jnp.square(x - mu), axis=-1, keepdims=True)
    xn = (x - mu) * jax.lax.rsqrt(var + LN_EPS)
    y_ref[...] = (xn * g_ref[...] + b_ref[...]).astype(y_ref.dtype)


# ----------------------------------------------------------------------------
# Kernel wrappers (tiled grids)
# ----------------------------------------------------------------------------

def tiled_linear(x2d, w, b, activation=None, out_dtype=jnp.bfloat16):
    """x2d:(M,K) f32 @ w:(K,N) bf16 + b:(N,) f32 -> (M,N), tiled (tm,tn,tk) grid."""
    M, K = x2d.shape
    Nout = w.shape[1]
    tm, tn, tk = _fit_tile(M, TM), _fit_tile(Nout, TN), _fit_tile(K, TK)
    kernel = functools.partial(_matmul_kernel, activation=activation)
    return pl.pallas_call(
        kernel,
        out_shape=jax.ShapeDtypeStruct((M, Nout), out_dtype),
        grid=(M // tm, Nout // tn, K // tk),
        in_specs=[
            pl.BlockSpec((tm, tk), lambda i, j, k: (i, k)),
            pl.BlockSpec((tk, tn), lambda i, j, k: (k, j)),
            pl.BlockSpec((1, tn), lambda i, j, k: (0, j)),
        ],
        out_specs=pl.BlockSpec((tm, tn), lambda i, j, k: (i, j)),
        scratch_shapes=[pltpu.VMEM((tm, tn), jnp.float32)],
        compiler_params=pltpu.CompilerParams(
            dimension_semantics=("parallel", "parallel", "arbitrary")),
    )(x2d, w, b.reshape(1, Nout))


def self_attention(qkv2d, attn_mask, kpad3, N, L, nhead, scale):
    """qkv2d:(N*L,3E) bf16 -> (N*L,E) bf16; grid over batch, per-batch mask reuse."""
    E3 = qkv2d.shape[1]
    E = E3 // 3
    kernel = functools.partial(_self_attn_kernel, nhead=nhead, scale=scale)
    return pl.pallas_call(
        kernel,
        out_shape=jax.ShapeDtypeStruct((N * L, E), jnp.bfloat16),
        grid=(N,),
        in_specs=[
            pl.BlockSpec((L, E3), lambda n: (n, 0)),      # per-batch QKV rows
            pl.BlockSpec((L, L), lambda n: (0, 0)),       # shared (Lq,Lk) attn mask
            pl.BlockSpec((1, 1, L), lambda n: (n, 0, 0)), # per-batch key padding
        ],
        out_specs=pl.BlockSpec((L, E), lambda n: (n, 0)),
        compiler_params=pltpu.CompilerParams(dimension_semantics=("parallel",)),
    )(qkv2d, attn_mask, kpad3)


def cross_attention(q2d, kv2d, kpad3, N, T, S, nhead, scale):
    E = q2d.shape[1]
    E2 = kv2d.shape[1]
    kernel = functools.partial(_cross_attn_kernel, nhead=nhead, scale=scale)
    return pl.pallas_call(
        kernel,
        out_shape=jax.ShapeDtypeStruct((N * T, E), jnp.bfloat16),
        grid=(N,),
        in_specs=[
            pl.BlockSpec((T, E), lambda n: (n, 0)),
            pl.BlockSpec((S, E2), lambda n: (n, 0)),
            pl.BlockSpec((1, 1, S), lambda n: (n, 0, 0)),
        ],
        out_specs=pl.BlockSpec((T, E), lambda n: (n, 0)),
        compiler_params=pltpu.CompilerParams(dimension_semantics=("parallel",)),
    )(q2d, kv2d, kpad3)


def outproj_residual_ln(o2d, res2d, wo, bo, gamma, beta):
    M, E = res2d.shape
    tm = _fit_tile(M, TM)
    return pl.pallas_call(
        _outproj_res_ln_kernel,
        out_shape=jax.ShapeDtypeStruct((M, E), jnp.float32),
        grid=(M // tm,),
        in_specs=[
            pl.BlockSpec((tm, E), lambda i: (i, 0)),
            pl.BlockSpec((tm, E), lambda i: (i, 0)),
            pl.BlockSpec((E, E), lambda i: (0, 0)),
            pl.BlockSpec((1, E), lambda i: (0, 0)),
            pl.BlockSpec((1, E), lambda i: (0, 0)),
            pl.BlockSpec((1, E), lambda i: (0, 0)),
        ],
        out_specs=pl.BlockSpec((tm, E), lambda i: (i, 0)),
        compiler_params=pltpu.CompilerParams(dimension_semantics=("parallel",)),
    )(o2d, res2d, wo, bo.reshape(1, E), gamma.reshape(1, E), beta.reshape(1, E))


def ffn_residual_ln(x2d, w1, b1, w2, b2, gamma, beta):
    M, E = x2d.shape
    FF = w1.shape[1]
    tm = _fit_tile(M, TM)
    return pl.pallas_call(
        _ffn_res_ln_kernel,
        out_shape=jax.ShapeDtypeStruct((M, E), jnp.float32),
        grid=(M // tm,),
        in_specs=[
            pl.BlockSpec((tm, E), lambda i: (i, 0)),
            pl.BlockSpec((E, FF), lambda i: (0, 0)),
            pl.BlockSpec((1, FF), lambda i: (0, 0)),
            pl.BlockSpec((FF, E), lambda i: (0, 0)),
            pl.BlockSpec((1, E), lambda i: (0, 0)),
            pl.BlockSpec((1, E), lambda i: (0, 0)),
            pl.BlockSpec((1, E), lambda i: (0, 0)),
        ],
        out_specs=pl.BlockSpec((tm, E), lambda i: (i, 0)),
        compiler_params=pltpu.CompilerParams(dimension_semantics=("parallel",)),
    )(x2d, w1, b1.reshape(1, FF), w2, b2.reshape(1, E),
      gamma.reshape(1, E), beta.reshape(1, E))


# ----------------------------------------------------------------------------
# Model glue (plain JAX: embedding gather, reshapes, mask prep); batch-major layout
# ----------------------------------------------------------------------------

def self_attention_block(x, p, nhead, attn_mask, kpad3, norm_g, norm_b):
    N, L, E = x.shape
    dh = E // nhead
    x2d = x.reshape(N * L, E)
    qkv = tiled_linear(x2d, p["qkv_w"], p["qkv_b"])                  # (N*L, 3E) bf16
    o2d = self_attention(qkv, attn_mask, kpad3, N, L, nhead, 1.0 / math.sqrt(dh))
    y = outproj_residual_ln(o2d, x2d, p["out_w"], p["out_b"], norm_g, norm_b)
    return y.reshape(N, L, E)


def cross_attention_block(x, memory, p, nhead, mem_kpad3, norm_g, norm_b):
    N, T, E = x.shape
    S = memory.shape[1]
    dh = E // nhead
    x2d = x.reshape(N * T, E)
    m2d = memory.reshape(N * S, E)
    q2d = tiled_linear(x2d, p["q_w"], p["q_b"])                      # (N*T, E)  bf16
    kv2d = tiled_linear(m2d, p["kv_w"], p["kv_b"])                   # (N*S, 2E) bf16
    o2d = cross_attention(q2d, kv2d, mem_kpad3, N, T, S, nhead, 1.0 / math.sqrt(dh))
    y = outproj_residual_ln(o2d, x2d, p["out_w"], p["out_b"], norm_g, norm_b)
    return y.reshape(N, T, E)


def encoder_layer(x, p, nhead, attn_mask, kpad3):
    """PyTorch TransformerEncoderLayer defaults: post-norm, relu, eval-mode dropout."""
    N, S, E = x.shape
    x = self_attention_block(x, p["self_attn"], nhead, attn_mask, kpad3,
                             p["norm1_g"], p["norm1_b"])
    y = ffn_residual_ln(x.reshape(N * S, E), p["lin1_w"], p["lin1_b"],
                        p["lin2_w"], p["lin2_b"], p["norm2_g"], p["norm2_b"])
    return y.reshape(N, S, E)


def decoder_layer(x, memory, p, nhead, self_mask, self_kpad3, mem_kpad3):
    N, T, E = x.shape
    x = self_attention_block(x, p["self_attn"], nhead, self_mask, self_kpad3,
                             p["norm1_g"], p["norm1_b"])
    x = cross_attention_block(x, memory, p["cross_attn"], nhead, mem_kpad3,
                              p["norm2_g"], p["norm2_b"])
    y = ffn_residual_ln(x.reshape(N * T, E), p["lin1_w"], p["lin1_b"],
                        p["lin2_w"], p["lin2_b"], p["norm3_g"], p["norm3_b"])
    return y.reshape(N, T, E)


def positional_encoding_table(maxlen, emb_size):
    den = jnp.exp(-jnp.arange(0, emb_size, 2, dtype=jnp.float32) * math.log(10000.0) / emb_size)
    pos = jnp.arange(0, maxlen, dtype=jnp.float32).reshape(maxlen, 1)
    pe = jnp.zeros((maxlen, emb_size), jnp.float32)
    pe = pe.at[:, 0::2].set(jnp.sin(pos * den))
    pe = pe.at[:, 1::2].set(jnp.cos(pos * den))
    return pe                                                       # (maxlen, E)


def token_embed(tokens_nl, table, emb_size):
    # TODO(synk): embedding gather stays in plain JAX (a DMA-gather kernel is overkill here).
    return jnp.take(table, tokens_nl.astype(jnp.int32), axis=0) * math.sqrt(emb_size)


def seq2seq_forward(params, src, tgt, src_mask, tgt_mask,
                    src_padding_mask, tgt_padding_mask, memory_key_padding_mask,
                    *, nhead):
    E = params["pos_table"].shape[-1]
    S, N = src.shape
    T, _ = tgt.shape

    # Batch-major activations (N, L, E); tokens come in sequence-first like PyTorch.
    src_emb = token_embed(src.T, params["src_emb"], E) + params["pos_table"][:S][None, :, :]
    tgt_emb = token_embed(tgt.T, params["tgt_emb"], E) + params["pos_table"][:T][None, :, :]

    # Key-padding masks as small (N, 1, Lk) float tiles (1.0 = pad); attn masks stay (Lq, Lk).
    src_kpad = src_padding_mask.astype(jnp.float32).reshape(N, 1, S)
    tgt_kpad = tgt_padding_mask.astype(jnp.float32).reshape(N, 1, T)
    mem_kpad = memory_key_padding_mask.astype(jnp.float32).reshape(N, 1, S)
    src_mask_f = jnp.maximum(src_mask.astype(jnp.float32), NEG_INF)   # keep finite
    tgt_mask_f = jnp.maximum(tgt_mask.astype(jnp.float32), NEG_INF)

    mem = src_emb
    for p in params["encoder_layers"]:
        mem = encoder_layer(mem, p, nhead, src_mask_f, src_kpad)

    out = tgt_emb
    for p in params["decoder_layers"]:
        out = decoder_layer(out, mem, p, nhead, tgt_mask_f, tgt_kpad, mem_kpad)

    V = params["gen_w"].shape[1]
    logits = tiled_linear(out.reshape(N * T, E), params["gen_w"], params["gen_b"],
                          out_dtype=jnp.float32)                     # vocab-tiled grid
    return logits.reshape(N, T, V).transpose(1, 0, 2)                # (T, N, V), like PyTorch


# ----------------------------------------------------------------------------
# Deterministic parameter initialization (synthetic weights)
# Weights are stored pre-transposed (matmul-ready, (in, out)) and in bf16;
# biases / LayerNorm params stay f32.
# ----------------------------------------------------------------------------

def init_params(key, num_enc, num_dec, E, nhead, src_vocab, tgt_vocab, ff, maxlen=512):
    keys = iter(jax.random.split(key, 512))

    def w(shape, scale=0.05):
        return (scale * jax.random.normal(next(keys), shape, jnp.float32)).astype(jnp.bfloat16)

    def f32(shape, scale=0.05):
        return (scale * jax.random.normal(next(keys), shape, jnp.float32)).astype(jnp.float32)

    def self_mha():
        return dict(qkv_w=w((E, 3 * E)), qkv_b=f32((3 * E,)),
                    out_w=w((E, E)), out_b=f32((E,)))

    def cross_mha():
        return dict(q_w=w((E, E)), q_b=f32((E,)),
                    kv_w=w((E, 2 * E)), kv_b=f32((2 * E,)),
                    out_w=w((E, E)), out_b=f32((E,)))

    def enc():
        return dict(self_attn=self_mha(),
                    lin1_w=w((E, ff)), lin1_b=f32((ff,)),
                    lin2_w=w((ff, E)), lin2_b=f32((E,)),
                    norm1_g=jnp.ones((E,), jnp.float32), norm1_b=jnp.zeros((E,), jnp.float32),
                    norm2_g=jnp.ones((E,), jnp.float32), norm2_b=jnp.zeros((E,), jnp.float32))

    def dec():
        return dict(self_attn=self_mha(), cross_attn=cross_mha(),
                    lin1_w=w((E, ff)), lin1_b=f32((ff,)),
                    lin2_w=w((ff, E)), lin2_b=f32((E,)),
                    norm1_g=jnp.ones((E,), jnp.float32), norm1_b=jnp.zeros((E,), jnp.float32),
                    norm2_g=jnp.ones((E,), jnp.float32), norm2_b=jnp.zeros((E,), jnp.float32),
                    norm3_g=jnp.ones((E,), jnp.float32), norm3_b=jnp.zeros((E,), jnp.float32))

    return dict(
        src_emb=f32((src_vocab, E), scale=1.0),
        tgt_emb=f32((tgt_vocab, E), scale=1.0),
        pos_table=positional_encoding_table(maxlen, E),
        encoder_layers=[enc() for _ in range(num_enc)],
        decoder_layers=[dec() for _ in range(num_dec)],
        gen_w=w((E, tgt_vocab)),
        gen_b=f32((tgt_vocab,)),
    )


# ----------------------------------------------------------------------------
# Main
# ----------------------------------------------------------------------------

if __name__ == "__main__":
    # Small config consistent with the module constructor.
    NUM_ENC, NUM_DEC = 2, 2
    EMB, NHEAD, FF = 32, 4, 64
    SRC_VOCAB, TGT_VOCAB = 50, 60
    S, T, N = 8, 8, 2          # src len, tgt len, batch

    key = jax.random.PRNGKey(0)
    pkey, skey, tkey = jax.random.split(key, 3)
    params = init_params(pkey, NUM_ENC, NUM_DEC, EMB, NHEAD, SRC_VOCAB, TGT_VOCAB, FF)

    src = jax.random.randint(skey, (S, N), 0, SRC_VOCAB, dtype=jnp.int32)
    tgt = jax.random.randint(tkey, (T, N), 0, TGT_VOCAB, dtype=jnp.int32)

    # Masks as the usual NMT training setup produces them (finite -1e30 "minus inf").
    src_mask = jnp.zeros((S, S), jnp.float32)
    tgt_mask = jnp.where(jnp.triu(jnp.ones((T, T), bool), k=1), NEG_INF, 0.0).astype(jnp.float32)
    src_lens = jnp.array([S, S - 2])
    tgt_lens = jnp.array([T, T - 1])
    src_padding_mask = jnp.arange(S)[None, :] >= src_lens[:, None]      # (N, S) True = pad
    tgt_padding_mask = jnp.arange(T)[None, :] >= tgt_lens[:, None]      # (N, T)
    memory_key_padding_mask = src_padding_mask

    fwd = jax.jit(functools.partial(seq2seq_forward, nhead=NHEAD))
    logits = fwd(params, src, tgt, src_mask, tgt_mask,
                 src_padding_mask, tgt_padding_mask, memory_key_padding_mask)
    jax.block_until_ready(logits)

    assert logits.shape == (T, N, TGT_VOCAB), logits.shape
    assert bool(jnp.all(jnp.isfinite(logits)))
    print("KERNEL_OK")
</pallas_src>

<mosaic_0001>
module attributes {stable_mosaic.version = 11 : i64} {
  func.func @_outproj_res_ln_kernel(%arg0: i32, %arg1: memref<16x32xbf16, #tpu.memory_space<vmem>>, %arg2: memref<16x32xf32, #tpu.memory_space<vmem>>, %arg3: memref<32x32xbf16, #tpu.memory_space<vmem>>, %arg4: memref<1x32xf32, #tpu.memory_space<vmem>>, %arg5: memref<1x32xf32, #tpu.memory_space<vmem>>, %arg6: memref<1x32xf32, #tpu.memory_space<vmem>>, %arg7: memref<16x32xf32, #tpu.memory_space<vmem>>) attributes {dimension_semantics = [#tpu.dimension_semantics<parallel>], iteration_bounds = array<i64: 1>, scalar_prefetch = 0 : i64, scratch_operands = 0 : i64, tpu.core_type = #tpu.core_type<tc>, window_params = [{transform_indices = @transform_0, window_bounds = array<i64: 16, 32>}, {transform_indices = @transform_1, window_bounds = array<i64: 16, 32>}, {pipeline_mode = #tpu.pipeline_mode<synchronous>, transform_indices = @transform_2, window_bounds = array<i64: 32, 32>}, {pipeline_mode = #tpu.pipeline_mode<synchronous>, transform_indices = @transform_3, window_bounds = array<i64: 1, 32>}, {pipeline_mode = #tpu.pipeline_mode<synchronous>, transform_indices = @transform_4, window_bounds = array<i64: 1, 32>}, {pipeline_mode = #tpu.pipeline_mode<synchronous>, transform_indices = @transform_5, window_bounds = array<i64: 1, 32>}, {transform_indices = @transform_6, window_bounds = array<i64: 16, 32>}]} {
    %c0 = arith.constant 0 : index
    %c0_0 = arith.constant 0 : index
    %0 = vector.load %arg1[%c0, %c0_0] : memref<16x32xbf16, #tpu.memory_space<vmem>>, vector<16x32xbf16>
    %c0_1 = arith.constant 0 : index
    %c0_2 = arith.constant 0 : index
    %1 = vector.load %arg3[%c0_1, %c0_2] : memref<32x32xbf16, #tpu.memory_space<vmem>>, vector<32x32xbf16>
    %cst = arith.constant dense<0.000000e+00> : vector<16x32xf32>
    %2 = tpu.matmul %0, %1, %cst {dimension_numbers = #tpu.dot_dimension_numbers<[1], [0], [0], [1], [0, 0, 1, 1], [], []>} : vector<16x32xbf16>, vector<32x32xbf16>, vector<16x32xf32> -> vector<16x32xf32>
    %c0_3 = arith.constant 0 : index
    %c0_4 = arith.constant 0 : index
    %3 = vector.load %arg4[%c0_3, %c0_4] : memref<1x32xf32, #tpu.memory_space<vmem>>, vector<1x32xf32>
    %4 = vector.broadcast %3 : vector<1x32xf32> to vector<16x32xf32>
    %5 = arith.addf %2, %4 : vector<16x32xf32>
    %c0_5 = arith.constant 0 : index
    %c0_6 = arith.constant 0 : index
    %6 = vector.load %arg2[%c0_5, %c0_6] : memref<16x32xf32, #tpu.memory_space<vmem>>, vector<16x32xf32>
    %7 = arith.addf %6, %5 : vector<16x32xf32>
    %cst_7 = arith.constant dense<0.000000e+00> : vector<16xf32>
    %8 = vector.multi_reduction <add>, %7, %cst_7 [1] : vector<16x32xf32> to vector<16xf32>
    %9 = vector.shape_cast %8 : vector<16xf32> to vector<16x1xf32>
    %cst_8 = arith.constant 3.200000e+01 : f32
    %10 = vector.broadcast %cst_8 : f32 to vector<16x1xf32>
    %11 = arith.divf %9, %10 : vector<16x1xf32>
    %12 = vector.broadcast %11 : vector<16x1xf32> to vector<16x32xf32>
    %13 = arith.subf %7, %12 : vector<16x32xf32>
    %14 = arith.mulf %13, %13 : vector<16x32xf32>
    %cst_9 = arith.constant dense<0.000000e+00> : vector<16xf32>
    %15 = vector.multi_reduction <add>, %14, %cst_9 [1] : vector<16x32xf32> to vector<16xf32>
    %16 = vector.shape_cast %15 : vector<16xf32> to vector<16x1xf32>
    %cst_10 = arith.constant 3.200000e+01 : f32
    %17 = vector.broadcast %cst_10 : f32 to vector<16x1xf32>
    %18 = arith.divf %16, %17 : vector<16x1xf32>
    %19 = vector.broadcast %11 : vector<16x1xf32> to vector<16x32xf32>
    %20 = arith.subf %7, %19 : vector<16x32xf32>
    %cst_11 = arith.constant 9.99999974E-6 : f32
    %21 = vector.broadcast %cst_11 : f32 to vector<16x1xf32>
    %22 = arith.addf %18, %21 : vector<16x1xf32>
    %23 = math.rsqrt %22 : vector<16x1xf32>
    %24 = vector.broadcast %23 : vector<16x1xf32> to vector<16x32xf32>
    %25 = arith.mulf %20, %24 : vector<16x32xf32>
    %c0_12 = arith.constant 0 : index
    %c0_13 = arith.constant 0 : index
    %26 = vector.load %arg5[%c0_12, %c0_13] : memref<1x32xf32, #tpu.memory_space<vmem>>, vector<1x32xf32>
    %27 = vector.broadcast %26 : vector<1x32xf32> to vector<16x32xf32>
    %28 = arith.mulf %25, %27 : vector<16x32xf32>
    %c0_14 = arith.constant 0 : index
    %c0_15 = arith.constant 0 : index
    %29 = vector.load %arg6[%c0_14, %c0_15] : memref<1x32xf32, #tpu.memory_space<vmem>>, vector<1x32xf32>
    %30 = vector.broadcast %29 : vector<1x32xf32> to vector<16x32xf32>
    %31 = arith.addf %28, %30 : vector<16x32xf32>
    %c0_16 = arith.constant 0 : index
    %c0_17 = arith.constant 0 : index
    %32 = vector.load %arg7[%c0_16, %c0_17] : memref<16x32xf32, #tpu.memory_space<vmem>>, vector<16x32xf32>
    tpu.vector_store %arg7[%c0_16, %c0_17], %31 {strides = array<i32>} : memref<16x32xf32, #tpu.memory_space<vmem>>, vector<16x32xf32>,
    return
  }
  func.func @transform_0(%arg0: i32) -> (i32, i32) {
    %c0_i32 = arith.constant 0 : i32
    %c0_i32_0 = arith.constant 0 : i32
    return %arg0, %c0_i32 : i32, i32
  }
  func.func @transform_1(%arg0: i32) -> (i32, i32) {
    %c0_i32 = arith.constant 0 : i32
    %c0_i32_0 = arith.constant 0 : i32
    return %arg0, %c0_i32 : i32, i32
  }
  func.func @transform_2(%arg0: i32) -> (i32, i32) {
    %c0_i32 = arith.constant 0 : i32
    %c0_i32_0 = arith.constant 0 : i32
    %c0_i32_1 = arith.constant 0 : i32
    return %c0_i32, %c0_i32_0 : i32, i32
  }
  func.func @transform_3(%arg0: i32) -> (i32, i32) {
    %c0_i32 = arith.constant 0 : i32
    %c0_i32_0 = arith.constant 0 : i32
    %c0_i32_1 = arith.constant 0 : i32
    return %c0_i32, %c0_i32_0 : i32, i32
  }
  func.func @transform_4(%arg0: i32) -> (i32, i32) {
    %c0_i32 = arith.constant 0 : i32
    %c0_i32_0 = arith.constant 0 : i32
    %c0_i32_1 = arith.constant 0 : i32
    return %c0_i32, %c0_i32_0 : i32, i32
  }
  func.func @transform_5(%arg0: i32) -> (i32, i32) {
    %c0_i32 = arith.constant 0 : i32
    %c0_i32_0 = arith.constant 0 : i32
    %c0_i32_1 = arith.constant 0 : i32
    return %c0_i32, %c0_i32_0 : i32, i32
  }
  func.func @transform_6(%arg0: i32) -> (i32, i32) {
    %c0_i32 = arith.constant 0 : i32
    %c0_i32_0 = arith.constant 0 : i32
    return %arg0, %c0_i32 : i32, i32
  }
}

module attributes {stable_mosaic.version = 11 : i64} {
  func.func @_self_attn_kernel(%arg0: i32, %arg1: memref<8x96xbf16, #tpu.memory_space<vmem>>, %arg2: memref<8x8xf32, #tpu.memory_space<vmem>>, %arg3: memref<1x1x8xf32, #tpu.memory_space<vmem>>, %arg4: memref<8x32xbf16, #tpu.memory_space<vmem>>) attributes {dimension_semantics = [#tpu.dimension_semantics<parallel>], iteration_bounds = array<i64: 2>, scalar_prefetch = 0 : i64, scratch_operands = 0 : i64, tpu.core_type = #tpu.core_type<tc>, window_params = [{transform_indices = @transform_0, window_bounds = array<i64: 8, 96>}, {pipeline_mode = #tpu.pipeline_mode<synchronous>, transform_indices = @transform_1, window_bounds = array<i64: 8, 8>}, {transform_indices = @transform_2, window_bounds = array<i64: 1, 1, 8>}, {transform_indices = @transform_3, window_bounds = array<i64: 8, 32>}]} {
    %c0 = arith.constant 0 : index
    %c0_0 = arith.constant 0 : index
    %0 = vector.load %arg1[%c0, %c0_0] : memref<8x96xbf16, #tpu.memory_space<vmem>>, vector<8x96xbf16>
    %1 = vector.shape_cast %0 : vector<8x96xbf16> to vector<8x12x8xbf16>
    %2 = tpu.transpose %1, [1, 0, 2] : vector<8x12x8xbf16> -> vector<12x8x8xbf16>
    %3 = vector.extract_strided_slice %2 {offsets = [0, 0, 0], sizes = [4, 8, 8], strides = [1, 1, 1]} : vector<12x8x8xbf16> to vector<4x8x8xbf16>
    %4 = vector.extract_strided_slice %2 {offsets = [4, 0, 0], sizes = [4, 8, 8], strides = [1, 1, 1]} : vector<12x8x8xbf16> to vector<4x8x8xbf16>
    %5 = vector.extract_strided_slice %2 {offsets = [8, 0, 0], sizes = [4, 8, 8], strides = [1, 1, 1]} : vector<12x8x8xbf16> to vector<4x8x8xbf16>
    "tpu.trace_start"() <{level = 10 : i32, message = "hqd,hkd->hqk"}> : () -> ()
    %cst = arith.constant dense<0.000000e+00> : vector<4x8x8xf32>
    %6 = tpu.matmul %3, %4, %cst {dimension_numbers = #tpu.dot_dimension_numbers<[2], [2], [1], [1], [0, 0, 0, 1, 1, 1], [0], [0]>} : vector<4x8x8xbf16>, vector<4x8x8xbf16>, vector<4x8x8xf32> -> vector<4x8x8xf32>
    "tpu.trace_stop"() : () -> ()
    %cst_1 = arith.constant 0.353553385 : f32
    %7 = vector.broadcast %cst_1 : f32 to vector<4x8x8xf32>
    %8 = arith.mulf %6, %7 : vector<4x8x8xf32>
    %c0_2 = arith.constant 0 : index
    %c0_3 = arith.constant 0 : index
    %9 = vector.load %arg2[%c0_2, %c0_3] : memref<8x8xf32, #tpu.memory_space<vmem>>, vector<8x8xf32>
    %10 = vector.shape_cast %9 : vector<8x8xf32> to vector<1x8x8xf32>
    %11 = vector.broadcast %10 : vector<1x8x8xf32> to vector<4x8x8xf32>
    %12 = arith.addf %8, %11 : vector<4x8x8xf32>
    %c0_4 = arith.constant 0 : index
    %c0_5 = arith.constant 0 : index
    %c0_6 = arith.constant 0 : index
    %13 = vector.load %arg3[%c0_4, %c0_5, %c0_6] : memref<1x1x8xf32, #tpu.memory_space<vmem>>, vector<1x1x8xf32>
    %cst_7 = arith.constant 5.000000e-01 : f32
    %14 = vector.broadcast %cst_7 : f32 to vector<1x1x8xf32>
    %15 = arith.cmpf ogt, %13, %14 : vector<1x1x8xf32>
    %cst_8 = arith.constant -1.000000e+30 : f32
    %16 = vector.shape_cast %15 : vector<1x1x8xi1> to vector<1x1x8xi1>
    %17 = vector.broadcast %16 : vector<1x1x8xi1> to vector<4x8x8xi1>
    %18 = vector.broadcast %cst_8 : f32 to vector<4x8x8xf32>
    %19 = arith.select %17, %18, %12 : vector<4x8x8xi1>, vector<4x8x8xf32>
    %cst_9 = arith.constant dense<0xFF800000> : vector<4x8xf32>
    %20 = vector.multi_reduction <maximumf>, %19, %cst_9 [2] : vector<4x8x8xf32> to vector<4x8xf32>
    %21 = vector.shape_cast %20 : vector<4x8xf32> to vector<4x8x1xf32>
    %22 = vector.broadcast %21 : vector<4x8x1xf32> to vector<4x8x8xf32>
    %23 = arith.subf %19, %22 : vector<4x8x8xf32>
    %24 = math.exp %23 : vector<4x8x8xf32>
    %cst_10 = arith.constant dense<0.000000e+00> : vector<4x8xf32>
    %25 = vector.multi_reduction <add>, %24, %cst_10 [2] : vector<4x8x8xf32> to vector<4x8xf32>
    %26 = vector.shape_cast %25 : vector<4x8xf32> to vector<4x8x1xf32>
    %27 = tpu.reciprocal %26 {approx = true} : vector<4x8x1xf32> -> vector<4x8x1xf32>
    %28 = vector.broadcast %27 : vector<4x8x1xf32> to vector<4x8x8xf32>
    %29 = arith.mulf %24, %28 : vector<4x8x8xf32>
    %30 = arith.truncf %29 : vector<4x8x8xf32> to vector<4x8x8xbf16>
    "tpu.trace_start"() <{level = 10 : i32, message = "hqk,hkd->hqd"}> : () -> ()
    %cst_11 = arith.constant dense<0.000000e+00> : vector<4x8x8xf32>
    %31 = tpu.matmul %30, %5, %cst_11 {dimension_numbers = #tpu.dot_dimension_numbers<[2], [1], [1], [2], [0, 0, 0, 1, 1, 2], [0], [0]>} : vector<4x8x8xbf16>, vector<4x8x8xbf16>, vector<4x8x8xf32> -> vector<4x8x8xf32>
    "tpu.trace_stop"() : () -> ()
    %32 = tpu.transpose %31, [1, 0, 2] : vector<4x8x8xf32> -> vector<8x4x8xf32>
    %33 = vector.shape_cast %32 : vector<8x4x8xf32> to vector<8x32xf32>
    %34 = arith.truncf %33 : vector<8x32xf32> to vector<8x32xbf16>
    %c0_12 = arith.constant 0 : index
    %c0_13 = arith.constant 0 : index
    %35 = vector.load %arg4[%c0_12, %c0_13] : memref<8x32xbf16, #tpu.memory_space<vmem>>, vector<8x32xbf16>
    tpu.vector_store %arg4[%c0_12, %c0_13], %34 {strides = array<i32>} : memref<8x32xbf16, #tpu.memory_space<vmem>>, vector<8x32xbf16>,
    return
  }
  func.func @transform_0(%arg0: i32) -> (i32, i32) {
    %c0_i32 = arith.constant 0 : i32
    %c0_i32_0 = arith.constant 0 : i32
    return %arg0, %c0_i32 : i32, i32
  }
  func.func @transform_1(%arg0: i32) -> (i32, i32) {
    %c0_i32 = arith.constant 0 : i32
    %c0_i32_0 = arith.constant 0 : i32
    %c0_i32_1 = arith.constant 0 : i32
    return %c0_i32, %c0_i32_0 : i32, i32
  }
  func.func @transform_2(%arg0: i32) -> (i32, i32, i32) {
    %c0_i32 = arith.constant 0 : i32
    %c0_i32_0 = arith.constant 0 : i32
    %c0_i32_1 = arith.constant 0 : i32
    return %arg0, %c0_i32, %c0_i32_0 : i32, i32, i32
  }
  func.func @transform_3(%arg0: i32) -> (i32, i32) {
    %c0_i32 = arith.constant 0 : i32
    %c0_i32_0 = arith.constant 0 : i32
    return %arg0, %c0_i32 : i32, i32
  }
}

module attributes {stable_mosaic.version = 11 : i64} {
  func.func @_ffn_res_ln_kernel(%arg0: i32, %arg1: memref<16x32xf32, #tpu.memory_space<vmem>>, %arg2: memref<32x64xbf16, #tpu.memory_space<vmem>>, %arg3: memref<1x64xf32, #tpu.memory_space<vmem>>, %arg4: memref<64x32xbf16, #tpu.memory_space<vmem>>, %arg5: memref<1x32xf32, #tpu.memory_space<vmem>>, %arg6: memref<1x32xf32, #tpu.memory_space<vmem>>, %arg7: memref<1x32xf32, #tpu.memory_space<vmem>>, %arg8: memref<16x32xf32, #tpu.memory_space<vmem>>) attributes {dimension_semantics = [#tpu.dimension_semantics<parallel>], iteration_bounds = array<i64: 1>, scalar_prefetch = 0 : i64, scratch_operands = 0 : i64, tpu.core_type = #tpu.core_type<tc>, window_params = [{transform_indices = @transform_0, window_bounds = array<i64: 16, 32>}, {pipeline_mode = #tpu.pipeline_mode<synchronous>, transform_indices = @transform_1, window_bounds = array<i64: 32, 64>}, {pipeline_mode = #tpu.pipeline_mode<synchronous>, transform_indices = @transform_2, window_bounds = array<i64: 1, 64>}, {pipeline_mode = #tpu.pipeline_mode<synchronous>, transform_indices = @transform_3, window_bounds = array<i64: 64, 32>}, {pipeline_mode = #tpu.pipeline_mode<synchronous>, transform_indices = @transform_4, window_bounds = array<i64: 1, 32>}, {pipeline_mode = #tpu.pipeline_mode<synchronous>, transform_indices = @transform_5, window_bounds = array<i64: 1, 32>}, {pipeline_mode = #tpu.pipeline_mode<synchronous>, transform_indices = @transform_6, window_bounds = array<i64: 1, 32>}, {transform_indices = @transform_7, window_bounds = array<i64: 16, 32>}]} {
    %c0 = arith.constant 0 : index
    %c0_0 = arith.constant 0 : index
    %0 = vector.load %arg1[%c0, %c0_0] : memref<16x32xf32, #tpu.memory_space<vmem>>, vector<16x32xf32>
    %1 = arith.truncf %0 : vector<16x32xf32> to vector<16x32xbf16>
    %c0_1 = arith.constant 0 : index
    %c0_2 = arith.constant 0 : index
    %2 = vector.load %arg2[%c0_1, %c0_2] : memref<32x64xbf16, #tpu.memory_space<vmem>>, vector<32x64xbf16>
    %cst = arith.constant dense<0.000000e+00> : vector<16x64xf32>
    %3 = tpu.matmul %1, %2, %cst {dimension_numbers = #tpu.dot_dimension_numbers<[1], [0], [0], [1], [0, 0, 1, 1], [], []>} : vector<16x32xbf16>, vector<32x64xbf16>, vector<16x64xf32> -> vector<16x64xf32>
    %c0_3 = arith.constant 0 : index
    %c0_4 = arith.constant 0 : index
    %4 = vector.load %arg3[%c0_3, %c0_4] : memref<1x64xf32, #tpu.memory_space<vmem>>, vector<1x64xf32>
    %5 = vector.broadcast %4 : vector<1x64xf32> to vector<16x64xf32>
    %6 = arith.addf %3, %5 : vector<16x64xf32>
    %cst_5 = arith.constant 0.000000e+00 : f32
    %7 = vector.broadcast %cst_5 : f32 to vector<16x64xf32>
    %8 = arith.maximumf %6, %7 : vector<16x64xf32>
    %9 = arith.truncf %8 : vector<16x64xf32> to vector<16x64xbf16>
    %c0_6 = arith.constant 0 : index
    %c0_7 = arith.constant 0 : index
    %10 = vector.load %arg4[%c0_6, %c0_7] : memref<64x32xbf16, #tpu.memory_space<vmem>>, vector<64x32xbf16>
    %cst_8 = arith.constant dense<0.000000e+00> : vector<16x32xf32>
    %11 = tpu.matmul %9, %10, %cst_8 {dimension_numbers = #tpu.dot_dimension_numbers<[1], [0], [0], [1], [0, 0, 1, 1], [], []>} : vector<16x64xbf16>, vector<64x32xbf16>, vector<16x32xf32> -> vector<16x32xf32>
    %c0_9 = arith.constant 0 : index
    %c0_10 = arith.constant 0 : index
    %12 = vector.load %arg5[%c0_9, %c0_10] : memref<1x32xf32, #tpu.memory_space<vmem>>, vector<1x32xf32>
    %13 = vector.broadcast %12 : vector<1x32xf32> to vector<16x32xf32>
    %14 = arith.addf %11, %13 : vector<16x32xf32>
    %15 = arith.addf %0, %14 : vector<16x32xf32>
    %cst_11 = arith.constant dense<0.000000e+00> : vector<16xf32>
    %16 = vector.multi_reduction <add>, %15, %cst_11 [1] : vector<16x32xf32> to vector<16xf32>
    %17 = vector.shape_cast %16 : vector<16xf32> to vector<16x1xf32>
    %cst_12 = arith.constant 3.200000e+01 : f32
    %18 = vector.broadcast %cst_12 : f32 to vector<16x1xf32>
    %19 = arith.divf %17, %18 : vector<16x1xf32>
    %20 = vector.broadcast %19 : vector<16x1xf32> to vector<16x32xf32>
    %21 = arith.subf %15, %20 : vector<16x32xf32>
    %22 = arith.mulf %21, %21 : vector<16x32xf32>
    %cst_13 = arith.constant dense<0.000000e+00> : vector<16xf32>
    %23 = vector.multi_reduction <add>, %22, %cst_13 [1] : vector<16x32xf32> to vector<16xf32>
    %24 = vector.shape_cast %23 : vector<16xf32> to vector<16x1xf32>
    %cst_14 = arith.constant 3.200000e+01 : f32
    %25 = vector.broadcast %cst_14 : f32 to vector<16x1xf32>
    %26 = arith.divf %24, %25 : vector<16x1xf32>
    %27 = vector.broadcast %19 : vector<16x1xf32> to vector<16x32xf32>
    %28 = arith.subf %15, %27 : vector<16x32xf32>
    %cst_15 = arith.constant 9.99999974E-6 : f32
    %29 = vector.broadcast %cst_15 : f32 to vector<16x1xf32>
    %30 = arith.addf %26, %29 : vector<16x1xf32>
    %31 = math.rsqrt %30 : vector<16x1xf32>
    %32 = vector.broadcast %31 : vector<16x1xf32> to vector<16x32xf32>
    %33 = arith.mulf %28, %32 : vector<16x32xf32>
    %c0_16 = arith.constant 0 : index
    %c0_17 = arith.constant 0 : index
    %34 = vector.load %arg6[%c0_16, %c0_17] : memref<1x32xf32, #tpu.memory_space<vmem>>, vector<1x32xf32>
    %35 = vector.broadcast %34 : vector<1x32xf32> to vector<16x32xf32>
    %36 = arith.mulf %33, %35 : vector<16x32xf32>
    %c0_18 = arith.constant 0 : index
    %c0_19 = arith.constant 0 : index
    %37 = vector.load %arg7[%c0_18, %c0_19] : memref<1x32xf32, #tpu.memory_space<vmem>>, vector<1x32xf32>
    %38 = vector.broadcast %37 : vector<1x32xf32> to vector<16x32xf32>
    %39 = arith.addf %36, %38 : vector<16x32xf32>
    %c0_20 = arith.constant 0 : index
    %c0_21 = arith.constant 0 : index
    %40 = vector.load %arg8[%c0_20, %c0_21] : memref<16x32xf32, #tpu.memory_space<vmem>>, vector<16x32xf32>
    tpu.vector_store %arg8[%c0_20, %c0_21], %39 {strides = array<i32>} : memref<16x32xf32, #tpu.memory_space<vmem>>, vector<16x32xf32>,
    return
  }
  func.func @transform_0(%arg0: i32) -> (i32, i32) {
    %c0_i32 = arith.constant 0 : i32
    %c0_i32_0 = arith.constant 0 : i32
    return %arg0, %c0_i32 : i32, i32
  }
  func.func @transform_1(%arg0: i32) -> (i32, i32) {
    %c0_i32 = arith.constant 0 : i32
    %c0_i32_0 = arith.constant 0 : i32
    %c0_i32_1 = arith.constant 0 : i32
    return %c0_i32, %c0_i32_0 : i32, i32
  }
  func.func @transform_2(%arg0: i32) -> (i32, i32) {
    %c0_i32 = arith.constant 0 : i32
    %c0_i32_0 = arith.constant 0 : i32
    %c0_i32_1 = arith.constant 0 : i32
    return %c0_i32, %c0_i32_0 : i32, i32
  }
  func.func @transform_3(%arg0: i32) -> (i32, i32) {
    %c0_i32 = arith.constant 0 : i32
    %c0_i32_0 = arith.constant 0 : i32
    %c0_i32_1 = arith.constant 0 : i32
    return %c0_i32, %c0_i32_0 : i32, i32
  }
  func.func @transform_4(%arg0: i32) -> (i32, i32) {
    %c0_i32 = arith.constant 0 : i32
    %c0_i32_0 = arith.constant 0 : i32
    %c0_i32_1 = arith.constant 0 : i32
    return %c0_i32, %c0_i32_0 : i32, i32
  }
  func.func @transform_5(%arg0: i32) -> (i32, i32) {
    %c0_i32 = arith.constant 0 : i32
    %c0_i32_0 = arith.constant 0 : i32
    %c0_i32_1 = arith.constant 0 : i32
    return %c0_i32, %c0_i32_0 : i32, i32
  }
  func.func @transform_6(%arg0: i32) -> (i32, i32) {
    %c0_i32 = arith.constant 0 : i32
    %c0_i32_0 = arith.constant 0 : i32
    %c0_i32_1 = arith.constant 0 : i32
    return %c0_i32, %c0_i32_0 : i32, i32
  }
  func.func @transform_7(%arg0: i32) -> (i32, i32) {
    %c0_i32 = arith.constant 0 : i32
    %c0_i32_0 = arith.constant 0 : i32
    return %arg0, %c0_i32 : i32, i32
  }
}

module attributes {stable_mosaic.version = 11 : i64} {
  func.func @_matmul_kernel(%arg0: i32, %arg1: i32, %arg2: i32, %arg3: memref<16x32xf32, #tpu.memory_space<vmem>>, %arg4: memref<32x96xbf16, #tpu.memory_space<vmem>>, %arg5: memref<1x96xf32, #tpu.memory_space<vmem>>, %arg6: memref<16x96xbf16, #tpu.memory_space<vmem>>, %arg7: memref<16x96xf32, #tpu.memory_space<vmem>>) attributes {dimension_semantics = [#tpu.dimension_semantics<parallel>, #tpu.dimension_semantics<parallel>, #tpu.dimension_semantics<arbitrary>], iteration_bounds = array<i64: 1, 1, 1>, scalar_prefetch = 0 : i64, scratch_operands = 1 : i64, tpu.core_type = #tpu.core_type<tc>, window_params = [{transform_indices = @transform_0, window_bounds = array<i64: 16, 32>}, {transform_indices = @transform_1, window_bounds = array<i64: 32, 96>}, {transform_indices = @transform_2, window_bounds = array<i64: 1, 96>}, {transform_indices = @transform_3, window_bounds = array<i64: 16, 96>}]} {
    %c0_i32 = arith.constant 0 : i32
    %0 = arith.cmpi eq, %arg2, %c0_i32 : i32
    %1 = arith.extui %0 : i1 to i32
    %c0_i32_0 = arith.constant 0 : i32
    %2 = arith.cmpi ne, %1, %c0_i32_0 : i32
    scf.if %2 {
      %cst_10 = arith.constant 0.000000e+00 : f32
      %13 = vector.broadcast %cst_10 : f32 to vector<16x96xf32>
      %c0_11 = arith.constant 0 : index
      %c0_12 = arith.constant 0 : index
      %14 = vector.load %arg7[%c0_11, %c0_12] : memref<16x96xf32, #tpu.memory_space<vmem>>, vector<16x96xf32>
      tpu.vector_store %arg7[%c0_11, %c0_12], %13 {strides = array<i32>} : memref<16x96xf32, #tpu.memory_space<vmem>>, vector<16x96xf32>,
    } else {
    }
    %c0 = arith.constant 0 : index
    %c0_1 = arith.constant 0 : index
    %3 = vector.load %arg7[%c0, %c0_1] : memref<16x96xf32, #tpu.memory_space<vmem>>, vector<16x96xf32>
    %c0_2 = arith.constant 0 : index
    %c0_3 = arith.constant 0 : index
    %4 = vector.load %arg3[%c0_2, %c0_3] : memref<16x32xf32, #tpu.memory_space<vmem>>, vector<16x32xf32>
    %5 = arith.truncf %4 : vector<16x32xf32> to vector<16x32xbf16>
    %c0_4 = arith.constant 0 : index
    %c0_5 = arith.constant 0 : index
    %6 = vector.load %arg4[%c0_4, %c0_5] : memref<32x96xbf16, #tpu.memory_space<vmem>>, vector<32x96xbf16>
    %cst = arith.constant dense<0.000000e+00> : vector<16x96xf32>
    %7 = tpu.matmul %5, %6, %cst {dimension_numbers = #tpu.dot_dimension_numbers<[1], [0], [0], [1], [0, 0, 1, 1], [], []>} : vector<16x32xbf16>, vector<32x96xbf16>, vector<16x96xf32> -> vector<16x96xf32>
    %8 = arith.addf %3, %7 : vector<16x96xf32>
    %c0_6 = arith.constant 0 : index
    %c0_7 = arith.constant 0 : index
    %9 = vector.load %arg7[%c0_6, %c0_7] : memref<16x96xf32, #tpu.memory_space<vmem>>, vector<16x96xf32>
    tpu.vector_store %arg7[%c0_6, %c0_7], %8 {strides = array<i32>} : memref<16x96xf32, #tpu.memory_space<vmem>>, vector<16x96xf32>,
    %c0_i32_8 = arith.constant 0 : i32
    %10 = arith.cmpi eq, %arg2, %c0_i32_8 : i32
    %11 = arith.extui %10 : i1 to i32
    %c0_i32_9 = arith.constant 0 : i32
    %12 = arith.cmpi ne, %11, %c0_i32_9 : i32
    scf.if %12 {
      %c0_10 = arith.constant 0 : index
      %c0_11 = arith.constant 0 : index
      %13 = vector.load %arg7[%c0_10, %c0_11] : memref<16x96xf32, #tpu.memory_space<vmem>>, vector<16x96xf32>
      %c0_12 = arith.constant 0 : index
      %c0_13 = arith.constant 0 : index
      %14 = vector.load %arg5[%c0_12, %c0_13] : memref<1x96xf32, #tpu.memory_space<vmem>>, vector<1x96xf32>
      %15 = vector.broadcast %14 : vector<1x96xf32> to vector<16x96xf32>
      %16 = arith.addf %13, %15 : vector<16x96xf32>
      %17 = arith.truncf %16 : vector<16x96xf32> to vector<16x96xbf16>
      %c0_14 = arith.constant 0 : index
      %c0_15 = arith.constant 0 : index
      %18 = vector.load %arg6[%c0_14, %c0_15] : memref<16x96xbf16, #tpu.memory_space<vmem>>, vector<16x96xbf16>
      tpu.vector_store %arg6[%c0_14, %c0_15], %17 {strides = array<i32>} : memref<16x96xbf16, #tpu.memory_space<vmem>>, vector<16x96xbf16>,
    } else {
    }
    return
  }
  func.func @transform_0(%arg0: i32, %arg1: i32, %arg2: i32) -> (i32, i32) {
    %c0_i32 = arith.constant 0 : i32
    return %arg0, %arg2 : i32, i32
  }
  func.func @transform_1(%arg0: i32, %arg1: i32, %arg2: i32) -> (i32, i32) {
    %c0_i32 = arith.constant 0 : i32
    return %arg2, %arg1 : i32, i32
  }
  func.func @transform_2(%arg0: i32, %arg1: i32, %arg2: i32) -> (i32, i32) {
    %c0_i32 = arith.constant 0 : i32
    %c0_i32_0 = arith.constant 0 : i32
    return %c0_i32, %arg1 : i32, i32
  }
  func.func @transform_3(%arg0: i32, %arg1: i32, %arg2: i32) -> (i32, i32) {
    %c0_i32 = arith.constant 0 : i32
    return %arg0, %arg1 : i32, i32
  }
}

module attributes {stable_mosaic.version = 11 : i64} {
  func.func @_matmul_kernel(%arg0: i32, %arg1: i32, %arg2: i32, %arg3: memref<16x32xf32, #tpu.memory_space<vmem>>, %arg4: memref<32x64xbf16, #tpu.memory_space<vmem>>, %arg5: memref<1x64xf32, #tpu.memory_space<vmem>>, %arg6: memref<16x64xbf16, #tpu.memory_space<vmem>>, %arg7: memref<16x64xf32, #tpu.memory_space<vmem>>) attributes {dimension_semantics = [#tpu.dimension_semantics<parallel>, #tpu.dimension_semantics<parallel>, #tpu.dimension_semantics<arbitrary>], iteration_bounds = array<i64: 1, 1, 1>, scalar_prefetch = 0 : i64, scratch_operands = 1 : i64, tpu.core_type = #tpu.core_type<tc>, window_params = [{transform_indices = @transform_0, window_bounds = array<i64: 16, 32>}, {transform_indices = @transform_1, window_bounds = array<i64: 32, 64>}, {transform_indices = @transform_2, window_bounds = array<i64: 1, 64>}, {transform_indices = @transform_3, window_bounds = array<i64: 16, 64>}]} {
    %c0_i32 = arith.constant 0 : i32
    %0 = arith.cmpi eq, %arg2, %c0_i32 : i32
    %1 = arith.extui %0 : i1 to i32
    %c0_i32_0 = arith.constant 0 : i32
    %2 = arith.cmpi ne, %1, %c0_i32_0 : i32
    scf.if %2 {
      %cst_10 = arith.constant 0.000000e+00 : f32
      %13 = vector.broadcast %cst_10 : f32 to vector<16x64xf32>
      %c0_11 = arith.constant 0 : index
      %c0_12 = arith.constant 0 : index
      %14 = vector.load %arg7[%c0_11, %c0_12] : memref<16x64xf32, #tpu.memory_space<vmem>>, vector<16x64xf32>
      tpu.vector_store %arg7[%c0_11, %c0_12], %13 {strides = array<i32>} : memref<16x64xf32, #tpu.memory_space<vmem>>, vector<16x64xf32>,
    } else {
    }
    %c0 = arith.constant 0 : index
    %c0_1 = arith.constant 0 : index
    %3 = vector.load %arg7[%c0, %c0_1] : memref<16x64xf32, #tpu.memory_space<vmem>>, vector<16x64xf32>
    %c0_2 = arith.constant 0 : index
    %c0_3 = arith.constant 0 : index
    %4 = vector.load %arg3[%c0_2, %c0_3] : memref<16x32xf32, #tpu.memory_space<vmem>>, vector<16x32xf32>
    %5 = arith.truncf %4 : vector<16x32xf32> to vector<16x32xbf16>
    %c0_4 = arith.constant 0 : index
    %c0_5 = arith.constant 0 : index
    %6 = vector.load %arg4[%c0_4, %c0_5] : memref<32x64xbf16, #tpu.memory_space<vmem>>, vector<32x64xbf16>
    %cst = arith.constant dense<0.000000e+00> : vector<16x64xf32>
    %7 = tpu.matmul %5, %6, %cst {dimension_numbers = #tpu.dot_dimension_numbers<[1], [0], [0], [1], [0, 0, 1, 1], [], []>} : vector<16x32xbf16>, vector<32x64xbf16>, vector<16x64xf32> -> vector<16x64xf32>
    %8 = arith.addf %3, %7 : vector<16x64xf32>
    %c0_6 = arith.constant 0 : index
    %c0_7 = arith.constant 0 : index
    %9 = vector.load %arg7[%c0_6, %c0_7] : memref<16x64xf32, #tpu.memory_space<vmem>>, vector<16x64xf32>
    tpu.vector_store %arg7[%c0_6, %c0_7], %8 {strides = array<i32>} : memref<16x64xf32, #tpu.memory_space<vmem>>, vector<16x64xf32>,
    %c0_i32_8 = arith.constant 0 : i32
    %10 = arith.cmpi eq, %arg2, %c0_i32_8 : i32
    %11 = arith.extui %10 : i1 to i32
    %c0_i32_9 = arith.constant 0 : i32
    %12 = arith.cmpi ne, %11, %c0_i32_9 : i32
    scf.if %12 {
      %c0_10 = arith.constant 0 : index
      %c0_11 = arith.constant 0 : index
      %13 = vector.load %arg7[%c0_10, %c0_11] : memref<16x64xf32, #tpu.memory_space<vmem>>, vector<16x64xf32>
      %c0_12 = arith.constant 0 : index
      %c0_13 = arith.constant 0 : index
      %14 = vector.load %arg5[%c0_12, %c0_13] : memref<1x64xf32, #tpu.memory_space<vmem>>, vector<1x64xf32>
      %15 = vector.broadcast %14 : vector<1x64xf32> to vector<16x64xf32>
      %16 = arith.addf %13, %15 : vector<16x64xf32>
      %17 = arith.truncf %16 : vector<16x64xf32> to vector<16x64xbf16>
      %c0_14 = arith.constant 0 : index
      %c0_15 = arith.constant 0 : index
      %18 = vector.load %arg6[%c0_14, %c0_15] : memref<16x64xbf16, #tpu.memory_space<vmem>>, vector<16x64xbf16>
      tpu.vector_store %arg6[%c0_14, %c0_15], %17 {strides = array<i32>} : memref<16x64xbf16, #tpu.memory_space<vmem>>, vector<16x64xbf16>,
    } else {
    }
    return
  }
  func.func @transform_0(%arg0: i32, %arg1: i32, %arg2: i32) -> (i32, i32) {
    %c0_i32 = arith.constant 0 : i32
    return %arg0, %arg2 : i32, i32
  }
  func.func @transform_1(%arg0: i32, %arg1: i32, %arg2: i32) -> (i32, i32) {
    %c0_i32 = arith.constant 0 : i32
    return %arg2, %arg1 : i32, i32
  }
  func.func @transform_2(%arg0: i32, %arg1: i32, %arg2: i32) -> (i32, i32) {
    %c0_i32 = arith.constant 0 : i32
    %c0_i32_0 = arith.constant 0 : i32
    return %c0_i32, %arg1 : i32, i32
  }
  func.func @transform_3(%arg0: i32, %arg1: i32, %arg2: i32) -> (i32, i32) {
    %c0_i32 = arith.constant 0 : i32
    return %arg0, %arg1 : i32, i32
  }
}

module attributes {stable_mosaic.version = 11 : i64} {
  func.func @_matmul_kernel(%arg0: i32, %arg1: i32, %arg2: i32, %arg3: memref<16x32xf32, #tpu.memory_space<vmem>>, %arg4: memref<32x32xbf16, #tpu.memory_space<vmem>>, %arg5: memref<1x32xf32, #tpu.memory_space<vmem>>, %arg6: memref<16x32xbf16, #tpu.memory_space<vmem>>, %arg7: memref<16x32xf32, #tpu.memory_space<vmem>>) attributes {dimension_semantics = [#tpu.dimension_semantics<parallel>, #tpu.dimension_semantics<parallel>, #tpu.dimension_semantics<arbitrary>], iteration_bounds = array<i64: 1, 1, 1>, scalar_prefetch = 0 : i64, scratch_operands = 1 : i64, tpu.core_type = #tpu.core_type<tc>, window_params = [{transform_indices = @transform_0, window_bounds = array<i64: 16, 32>}, {transform_indices = @transform_1, window_bounds = array<i64: 32, 32>}, {transform_indices = @transform_2, window_bounds = array<i64: 1, 32>}, {transform_indices = @transform_3, window_bounds = array<i64: 16, 32>}]} {
    %c0_i32 = arith.constant 0 : i32
    %0 = arith.cmpi eq, %arg2, %c0_i32 : i32
    %1 = arith.extui %0 : i1 to i32
    %c0_i32_0 = arith.constant 0 : i32
    %2 = arith.cmpi ne, %1, %c0_i32_0 : i32
    scf.if %2 {
      %cst_10 = arith.constant 0.000000e+00 : f32
      %13 = vector.broadcast %cst_10 : f32 to vector<16x32xf32>
      %c0_11 = arith.constant 0 : index
      %c0_12 = arith.constant 0 : index
      %14 = vector.load %arg7[%c0_11, %c0_12] : memref<16x32xf32, #tpu.memory_space<vmem>>, vector<16x32xf32>
      tpu.vector_store %arg7[%c0_11, %c0_12], %13 {strides = array<i32>} : memref<16x32xf32, #tpu.memory_space<vmem>>, vector<16x32xf32>,
    } else {
    }
    %c0 = arith.constant 0 : index
    %c0_1 = arith.constant 0 : index
    %3 = vector.load %arg7[%c0, %c0_1] : memref<16x32xf32, #tpu.memory_space<vmem>>, vector<16x32xf32>
    %c0_2 = arith.constant 0 : index
    %c0_3 = arith.constant 0 : index
    %4 = vector.load %arg3[%c0_2, %c0_3] : memref<16x32xf32, #tpu.memory_space<vmem>>, vector<16x32xf32>
    %5 = arith.truncf %4 : vector<16x32xf32> to vector<16x32xbf16>
    %c0_4 = arith.constant 0 : index
    %c0_5 = arith.constant 0 : index
    %6 = vector.load %arg4[%c0_4, %c0_5] : memref<32x32xbf16, #tpu.memory_space<vmem>>, vector<32x32xbf16>
    %cst = arith.constant dense<0.000000e+00> : vector<16x32xf32>
    %7 = tpu.matmul %5, %6, %cst {dimension_numbers = #tpu.dot_dimension_numbers<[1], [0], [0], [1], [0, 0, 1, 1], [], []>} : vector<16x32xbf16>, vector<32x32xbf16>, vector<16x32xf32> -> vector<16x32xf32>
    %8 = arith.addf %3, %7 : vector<16x32xf32>
    %c0_6 = arith.constant 0 : index
    %c0_7 = arith.constant 0 : index
    %9 = vector.load %arg7[%c0_6, %c0_7] : memref<16x32xf32, #tpu.memory_space<vmem>>, vector<16x32xf32>
    tpu.vector_store %arg7[%c0_6, %c0_7], %8 {strides = array<i32>} : memref<16x32xf32, #tpu.memory_space<vmem>>, vector<16x32xf32>,
    %c0_i32_8 = arith.constant 0 : i32
    %10 = arith.cmpi eq, %arg2, %c0_i32_8 : i32
    %11 = arith.extui %10 : i1 to i32
    %c0_i32_9 = arith.constant 0 : i32
    %12 = arith.cmpi ne, %11, %c0_i32_9 : i32
    scf.if %12 {
      %c0_10 = arith.constant 0 : index
      %c0_11 = arith.constant 0 : index
      %13 = vector.load %arg7[%c0_10, %c0_11] : memref<16x32xf32, #tpu.memory_space<vmem>>, vector<16x32xf32>
      %c0_12 = arith.constant 0 : index
      %c0_13 = arith.constant 0 : index
      %14 = vector.load %arg5[%c0_12, %c0_13] : memref<1x32xf32, #tpu.memory_space<vmem>>, vector<1x32xf32>
      %15 = vector.broadcast %14 : vector<1x32xf32> to vector<16x32xf32>
      %16 = arith.addf %13, %15 : vector<16x32xf32>
      %17 = arith.truncf %16 : vector<16x32xf32> to vector<16x32xbf16>
      %c0_14 = arith.constant 0 : index
      %c0_15 = arith.constant 0 : index
      %18 = vector.load %arg6[%c0_14, %c0_15] : memref<16x32xbf16, #tpu.memory_space<vmem>>, vector<16x32xbf16>
      tpu.vector_store %arg6[%c0_14, %c0_15], %17 {strides = array<i32>} : memref<16x32xbf16, #tpu.memory_space<vmem>>, vector<16x32xbf16>,
    } else {
    }
    return
  }
  func.func @transform_0(%arg0: i32, %arg1: i32, %arg2: i32) -> (i32, i32) {
    %c0_i32 = arith.constant 0 : i32
    return %arg0, %arg2 : i32, i32
  }
  func.func @transform_1(%arg0: i32, %arg1: i32, %arg2: i32) -> (i32, i32) {
    %c0_i32 = arith.constant 0 : i32
    return %arg2, %arg1 : i32, i32
  }
  func.func @transform_2(%arg0: i32, %arg1: i32, %arg2: i32) -> (i32, i32) {
    %c0_i32 = arith.constant 0 : i32
    %c0_i32_0 = arith.constant 0 : i32
    return %c0_i32, %arg1 : i32, i32
  }
  func.func @transform_3(%arg0: i32, %arg1: i32, %arg2: i32) -> (i32, i32) {
    %c0_i32 = arith.constant 0 : i32
    return %arg0, %arg1 : i32, i32
  }
}

module attributes {stable_mosaic.version = 11 : i64} {
  func.func @_cross_attn_kernel(%arg0: i32, %arg1: memref<8x32xbf16, #tpu.memory_space<vmem>>, %arg2: memref<8x64xbf16, #tpu.memory_space<vmem>>, %arg3: memref<1x1x8xf32, #tpu.memory_space<vmem>>, %arg4: memref<8x32xbf16, #tpu.memory_space<vmem>>) attributes {dimension_semantics = [#tpu.dimension_semantics<parallel>], iteration_bounds = array<i64: 2>, scalar_prefetch = 0 : i64, scratch_operands = 0 : i64, tpu.core_type = #tpu.core_type<tc>, window_params = [{transform_indices = @transform_0, window_bounds = array<i64: 8, 32>}, {transform_indices = @transform_1, window_bounds = array<i64: 8, 64>}, {transform_indices = @transform_2, window_bounds = array<i64: 1, 1, 8>}, {transform_indices = @transform_3, window_bounds = array<i64: 8, 32>}]} {
    %c0 = arith.constant 0 : index
    %c0_0 = arith.constant 0 : index
    %0 = vector.load %arg1[%c0, %c0_0] : memref<8x32xbf16, #tpu.memory_space<vmem>>, vector<8x32xbf16>
    %1 = vector.shape_cast %0 : vector<8x32xbf16> to vector<8x4x8xbf16>
    %2 = tpu.transpose %1, [1, 0, 2] : vector<8x4x8xbf16> -> vector<4x8x8xbf16>
    %c0_1 = arith.constant 0 : index
    %c0_2 = arith.constant 0 : index
    %3 = vector.load %arg2[%c0_1, %c0_2] : memref<8x64xbf16, #tpu.memory_space<vmem>>, vector<8x64xbf16>
    %4 = vector.shape_cast %3 : vector<8x64xbf16> to vector<8x8x8xbf16>
    %5 = tpu.transpose %4, [1, 0, 2] : vector<8x8x8xbf16> -> vector<8x8x8xbf16>
    %6 = vector.extract_strided_slice %5 {offsets = [0, 0, 0], sizes = [4, 8, 8], strides = [1, 1, 1]} : vector<8x8x8xbf16> to vector<4x8x8xbf16>
    %7 = vector.extract_strided_slice %5 {offsets = [4, 0, 0], sizes = [4, 8, 8], strides = [1, 1, 1]} : vector<8x8x8xbf16> to vector<4x8x8xbf16>
    "tpu.trace_start"() <{level = 10 : i32, message = "hqd,hkd->hqk"}> : () -> ()
    %cst = arith.constant dense<0.000000e+00> : vector<4x8x8xf32>
    %8 = tpu.matmul %2, %6, %cst {dimension_numbers = #tpu.dot_dimension_numbers<[2], [2], [1], [1], [0, 0, 0, 1, 1, 1], [0], [0]>} : vector<4x8x8xbf16>, vector<4x8x8xbf16>, vector<4x8x8xf32> -> vector<4x8x8xf32>
    "tpu.trace_stop"() : () -> ()
    %cst_3 = arith.constant 0.353553385 : f32
    %9 = vector.broadcast %cst_3 : f32 to vector<4x8x8xf32>
    %10 = arith.mulf %8, %9 : vector<4x8x8xf32>
    %c0_4 = arith.constant 0 : index
    %c0_5 = arith.constant 0 : index
    %c0_6 = arith.constant 0 : index
    %11 = vector.load %arg3[%c0_4, %c0_5, %c0_6] : memref<1x1x8xf32, #tpu.memory_space<vmem>>, vector<1x1x8xf32>
    %cst_7 = arith.constant 5.000000e-01 : f32
    %12 = vector.broadcast %cst_7 : f32 to vector<1x1x8xf32>
    %13 = arith.cmpf ogt, %11, %12 : vector<1x1x8xf32>
    %cst_8 = arith.constant -1.000000e+30 : f32
    %14 = vector.shape_cast %13 : vector<1x1x8xi1> to vector<1x1x8xi1>
    %15 = vector.broadcast %14 : vector<1x1x8xi1> to vector<4x8x8xi1>
    %16 = vector.broadcast %cst_8 : f32 to vector<4x8x8xf32>
    %17 = arith.select %15, %16, %10 : vector<4x8x8xi1>, vector<4x8x8xf32>
    %cst_9 = arith.constant dense<0xFF800000> : vector<4x8xf32>
    %18 = vector.multi_reduction <maximumf>, %17, %cst_9 [2] : vector<4x8x8xf32> to vector<4x8xf32>
    %19 = vector.shape_cast %18 : vector<4x8xf32> to vector<4x8x1xf32>
    %20 = vector.broadcast %19 : vector<4x8x1xf32> to vector<4x8x8xf32>
    %21 = arith.subf %17, %20 : vector<4x8x8xf32>
    %22 = math.exp %21 : vector<4x8x8xf32>
    %cst_10 = arith.constant dense<0.000000e+00> : vector<4x8xf32>
    %23 = vector.multi_reduction <add>, %22, %cst_10 [2] : vector<4x8x8xf32> to vector<4x8xf32>
    %24 = vector.shape_cast %23 : vector<4x8xf32> to vector<4x8x1xf32>
    %25 = tpu.reciprocal %24 {approx = true} : vector<4x8x1xf32> -> vector<4x8x1xf32>
    %26 = vector.broadcast %25 : vector<4x8x1xf32> to vector<4x8x8xf32>
    %27 = arith.mulf %22, %26 : vector<4x8x8xf32>
    %28 = arith.truncf %27 : vector<4x8x8xf32> to vector<4x8x8xbf16>
    "tpu.trace_start"() <{level = 10 : i32, message = "hqk,hkd->hqd"}> : () -> ()
    %cst_11 = arith.constant dense<0.000000e+00> : vector<4x8x8xf32>
    %29 = tpu.matmul %28, %7, %cst_11 {dimension_numbers = #tpu.dot_dimension_numbers<[2], [1], [1], [2], [0, 0, 0, 1, 1, 2], [0], [0]>} : vector<4x8x8xbf16>, vector<4x8x8xbf16>, vector<4x8x8xf32> -> vector<4x8x8xf32>
    "tpu.trace_stop"() : () -> ()
    %30 = tpu.transpose %29, [1, 0, 2] : vector<4x8x8xf32> -> vector<8x4x8xf32>
    %31 = vector.shape_cast %30 : vector<8x4x8xf32> to vector<8x32xf32>
    %32 = arith.truncf %31 : vector<8x32xf32> to vector<8x32xbf16>
    %c0_12 = arith.constant 0 : index
    %c0_13 = arith.constant 0 : index
    %33 = vector.load %arg4[%c0_12, %c0_13] : memref<8x32xbf16, #tpu.memory_space<vmem>>, vector<8x32xbf16>
    tpu.vector_store %arg4[%c0_12, %c0_13], %32 {strides = array<i32>} : memref<8x32xbf16, #tpu.memory_space<vmem>>, vector<8x32xbf16>,
    return
  }
  func.func @transform_0(%arg0: i32) -> (i32, i32) {
    %c0_i32 = arith.constant 0 : i32
    %c0_i32_0 = arith.constant 0 : i32
    return %arg0, %c0_i32 : i32, i32
  }
  func.func @transform_1(%arg0: i32) -> (i32, i32) {
    %c0_i32 = arith.constant 0 : i32
    %c0_i32_0 = arith.constant 0 : i32
    return %arg0, %c0_i32 : i32, i32
  }
  func.func @transform_2(%arg0: i32) -> (i32, i32, i32) {
    %c0_i32 = arith.constant 0 : i32
    %c0_i32_0 = arith.constant 0 : i32
    %c0_i32_1 = arith.constant 0 : i32
    return %arg0, %c0_i32, %c0_i32_0 : i32, i32, i32
  }
  func.func @transform_3(%arg0: i32) -> (i32, i32) {
    %c0_i32 = arith.constant 0 : i32
    %c0_i32_0 = arith.constant 0 : i32
    return %arg0, %c0_i32 : i32, i32
  }
}

module attributes {stable_mosaic.version = 11 : i64} {
  func.func @_matmul_kernel(%arg0: i32, %arg1: i32, %arg2: i32, %arg3: memref<16x32xf32, #tpu.memory_space<vmem>>, %arg4: memref<32x60xbf16, #tpu.memory_space<vmem>>, %arg5: memref<1x60xf32, #tpu.memory_space<vmem>>, %arg6: memref<16x60xf32, #tpu.memory_space<vmem>>, %arg7: memref<16x60xf32, #tpu.memory_space<vmem>>) attributes {dimension_semantics = [#tpu.dimension_semantics<parallel>, #tpu.dimension_semantics<parallel>, #tpu.dimension_semantics<arbitrary>], iteration_bounds = array<i64: 1, 1, 1>, scalar_prefetch = 0 : i64, scratch_operands = 1 : i64, tpu.core_type = #tpu.core_type<tc>, window_params = [{transform_indices = @transform_0, window_bounds = array<i64: 16, 32>}, {transform_indices = @transform_1, window_bounds = array<i64: 32, 60>}, {transform_indices = @transform_2, window_bounds = array<i64: 1, 60>}, {transform_indices = @transform_3, window_bounds = array<i64: 16, 60>}]} {
    %c0_i32 = arith.constant 0 : i32
    %0 = arith.cmpi eq, %arg2, %c0_i32 : i32
    %1 = arith.extui %0 : i1 to i32
    %c0_i32_0 = arith.constant 0 : i32
    %2 = arith.cmpi ne, %1, %c0_i32_0 : i32
    scf.if %2 {
      %cst_10 = arith.constant 0.000000e+00 : f32
      %13 = vector.broadcast %cst_10 : f32 to vector<16x60xf32>
      %c0_11 = arith.constant 0 : index
      %c0_12 = arith.constant 0 : index
      %14 = vector.load %arg7[%c0_11, %c0_12] : memref<16x60xf32, #tpu.memory_space<vmem>>, vector<16x60xf32>
      tpu.vector_store %arg7[%c0_11, %c0_12], %13 {strides = array<i32>} : memref<16x60xf32, #tpu.memory_space<vmem>>, vector<16x60xf32>,
    } else {
    }
    %c0 = arith.constant 0 : index
    %c0_1 = arith.constant 0 : index
    %3 = vector.load %arg7[%c0, %c0_1] : memref<16x60xf32, #tpu.memory_space<vmem>>, vector<16x60xf32>
    %c0_2 = arith.constant 0 : index
    %c0_3 = arith.constant 0 : index
    %4 = vector.load %arg3[%c0_2, %c0_3] : memref<16x32xf32, #tpu.memory_space<vmem>>, vector<16x32xf32>
    %5 = arith.truncf %4 : vector<16x32xf32> to vector<16x32xbf16>
    %c0_4 = arith.constant 0 : index
    %c0_5 = arith.constant 0 : index
    %6 = vector.load %arg4[%c0_4, %c0_5] : memref<32x60xbf16, #tpu.memory_space<vmem>>, vector<32x60xbf16>
    %cst = arith.constant dense<0.000000e+00> : vector<16x60xf32>
    %7 = tpu.matmul %5, %6, %cst {dimension_numbers = #tpu.dot_dimension_numbers<[1], [0], [0], [1], [0, 0, 1, 1], [], []>} : vector<16x32xbf16>, vector<32x60xbf16>, vector<16x60xf32> -> vector<16x60xf32>
    %8 = arith.addf %3, %7 : vector<16x60xf32>
    %c0_6 = arith.constant 0 : index
    %c0_7 = arith.constant 0 : index
    %9 = vector.load %arg7[%c0_6, %c0_7] : memref<16x60xf32, #tpu.memory_space<vmem>>, vector<16x60xf32>
    tpu.vector_store %arg7[%c0_6, %c0_7], %8 {strides = array<i32>} : memref<16x60xf32, #tpu.memory_space<vmem>>, vector<16x60xf32>,
    %c0_i32_8 = arith.constant 0 : i32
    %10 = arith.cmpi eq, %arg2, %c0_i32_8 : i32
    %11 = arith.extui %10 : i1 to i32
    %c0_i32_9 = arith.constant 0 : i32
    %12 = arith.cmpi ne, %11, %c0_i32_9 : i32
    scf.if %12 {
      %c0_10 = arith.constant 0 : index
      %c0_11 = arith.constant 0 : index
      %13 = vector.load %arg7[%c0_10, %c0_11] : memref<16x60xf32, #tpu.memory_space<vmem>>, vector<16x60xf32>
      %c0_12 = arith.constant 0 : index
      %c0_13 = arith.constant 0 : index
      %14 = vector.load %arg5[%c0_12, %c0_13] : memref<1x60xf32, #tpu.memory_space<vmem>>, vector<1x60xf32>
      %15 = vector.broadcast %14 : vector<1x60xf32> to vector<16x60xf32>
      %16 = arith.addf %13, %15 : vector<16x60xf32>
      %c0_14 = arith.constant 0 : index
      %c0_15 = arith.constant 0 : index
      %17 = vector.load %arg6[%c0_14, %c0_15] : memref<16x60xf32, #tpu.memory_space<vmem>>, vector<16x60xf32>
      tpu.vector_store %arg6[%c0_14, %c0_15], %16 {strides = array<i32>} : memref<16x60xf32, #tpu.memory_space<vmem>>, vector<16x60xf32>,
    } else {
    }
    return
  }
  func.func @transform_0(%arg0: i32, %arg1: i32, %arg2: i32) -> (i32, i32) {
    %c0_i32 = arith.constant 0 : i32
    return %arg0, %arg2 : i32, i32
  }
  func.func @transform_1(%arg0: i32, %arg1: i32, %arg2: i32) -> (i32, i32) {
    %c0_i32 = arith.constant 0 : i32
    return %arg2, %arg1 : i32, i32
  }
  func.func @transform_2(%arg0: i32, %arg1: i32, %arg2: i32) -> (i32, i32) {
    %c0_i32 = arith.constant 0 : i32
    %c0_i32_0 = arith.constant 0 : i32
    return %c0_i32, %arg1 : i32, i32
  }
  func.func @transform_3(%arg0: i32, %arg1: i32, %arg2: i32) -> (i32, i32) {
    %c0_i32 = arith.constant 0 : i32
    return %arg0, %arg1 : i32, i32
  }
}

</mosaic_0001>

<bundles_post_ra>
// kernel: seq2seq_forward.25
= control target key start
LH: loop header
LB: loop body
LE: loop exit
PB: predicated region body
PF: predicated region fallthrough
CT: control target
= control target key end

     0   :  { %vm19_vm0 = vcmask 785408   ;;  %v145_v0 = vmov 0.0   ;;  %vm146_vm1 = vmmov 0   ;;  %vm43_vm2 = vcmask 261120   ;;  %s192_s1 = inlined_call_operand.vmem [shape: bf16[32,96], index: 1, kind: input, shape index: {}]   ;;  %s193_s0 = inlined_call_operand.vmem [shape: f32[16,32], index: 0, kind: input, shape index: {}]   ;;  %s194_s2 = inlined_call_operand.vmem [shape: f32[1,96], index: 2, kind: input, shape index: {}]   ;;  %s195_s3 = inlined_call_operand.vmem [shape: bf16[16,96], index: 3, kind: output, shape index: {}]  }
   0x1   :  { %133 = vmatprep.subr.bf16.mxu0 %v145_v0  ;;  %v143_v1 = vld [vmem:[%s192_s1] sm:$0xff]   ;;  %137 = vmatprep.mubr.msk.bf16.mxu0 %vm146_vm1, %v145_v0  ;;  %20 = vst.msk [vmem:[#allocation2] sm:$0xff] %vm19_vm0, %v145_v0  ;;  %21 = vst.msk [vmem:[#allocation2 + $0x8] sm:$0xff] %vm19_vm0, %v145_v0  ;;  %v144_v2 = vld [vmem:[%s192_s1 + $0x8] sm:$0xff]   ;;  %vm115_vm3 = vcmask 781312  }
   0x2   :  { %134 = vmatpush3.bf16.msra.mxu0 %v143_v1  ;;  %v24_v3 = vld [vmem:[%s193_s0] sm:$0xff]  ;;  %v25_v4 = vld [vmem:[%s193_s0 + $0x8] sm:$0xff] }
   0x3   :  { %135 = vmatprep.subr.bf16.mxu0 %v145_v0  ;;  %v26_v5 = vpack.c.bf16 %v25_v4, %v24_v3  ;;  %v125_v14 = vld [vmem:[%s194_s2] ss:$0 sm:$0xff] }
   0x6   :  { %136 = vmatpush3.bf16.msra.mxu0 %v144_v2 }
   0x8   :  { %v22_v6 = vld [vmem:[#allocation2] sm:$0xff]  ;;  %v23_v8 = vld [vmem:[#allocation2 + $0x8] sm:$0xff] }
   0x9   :  { %138 = vmatmul.mubr.msk.bf16.vlgmr.msra.gmra.mrb[0].mxu0 %vm43_vm2, %v26_v5 }
  0xdc   :  { %v81_v7 = vpop.f32.mrb[0].mxu0 }
  0xdd   :  { %v88_v9 = vadd.f32 %v81_v7, %v22_v6  ;;  %v139_v10 = vpop.f32.mrb[1].mxu0 }
  0xde   :  { %v84_v11 = vpop.f32.mrb[2].mxu0 }
  0xdf   :  { %91 = vst.msk [vmem:[#allocation2] sm:$0xff] %vm19_vm0, %v88_v9  ;;  %v89_v12 = vadd.f32 %v84_v11, %v23_v8  ;;  %v140_v13 = vpop.f32.mrb[3].mxu0 }
  0xe1   :  { %92 = vst.msk [vmem:[#allocation2 + $0x8] sm:$0xff] %vm19_vm0, %v89_v12 }
  0xe6   :  { %v96_v15 = vld [vmem:[#allocation2] sm:$0xff] }
  0xe7   :  { %v105_v16 = vadd.f32 %v125_v14, %v96_v15 }
  0xe8   :  { %v97_v17 = vld [vmem:[#allocation2 + $0x8] sm:$0xff] }
  0xe9   :  { %v128_v18 = vpack.c.bf16 %v105_v16, %v105_v16  ;;  %v106_v19 = vadd.f32 %v125_v14, %v97_v17 }
  0xeb   :  { %116 = vst.msk [vmem:[%s195_s3] sm:$0xf] %vm115_vm3, %v128_v18  ;;  %v129_v20 = vpack.c.bf16 %v106_v19, %v106_v19 }
  0xed   :  { %117 = vst.msk [vmem:[%s195_s3 + $0x4] sm:$0xf] %vm115_vm3, %v129_v20 }

// kernel: seq2seq_forward.28
= control target key start
LH: loop header
LB: loop body
LE: loop exit
PB: predicated region body
PF: predicated region fallthrough
CT: control target
= control target key end

     0   :  { %v290_v0 = vmov 0.0   ;;  %vm291_vm0 = vmmov 0   ;;  %vm53_vm1 = vcmask 261120   ;;  %vm140_vm2 = vcmask 523264   ;;  %s381_s1 = inlined_call_operand.vmem [shape: bf16[32,64], index: 1, kind: input, shape index: {}]   ;;  %s382_s0 = inlined_call_operand.vmem [shape: f32[16,32], index: 0, kind: input, shape index: {}]   ;;  %s383_s3 = inlined_call_operand.vmem [shape: bf16[64,32], index: 3, kind: input, shape index: {}]   ;;  %s384_s2 = inlined_call_operand.vmem [shape: f32[1,64], index: 2, kind: input, shape index: {}]   ;;  %s385_s4 = inlined_call_operand.vmem [shape: f32[1,32], index: 4, kind: input, shape index: {}]   ;;  %s386_s5 = inlined_call_operand.vmem [shape: f32[1,32], index: 5, kind: input, shape index: {}]   ;;  %s387_s6 = inlined_call_operand.vmem [shape: f32[1,32], index: 6, kind: input, shape index: {}]   ;;  %s388_s7 = inlined_call_operand.vmem [shape: f32[16,32], index: 7, kind: output, shape index: {}]  }
   0x1   :  { %258 = vmatprep.subr.bf16.mxu0 %v290_v0  ;;  %v280_v1 = vld [vmem:[%s381_s1] sm:$0xff]   ;;  %262 = vmatprep.mubr.msk.bf16.mxu0 %vm291_vm0, %v290_v0  ;;  %v281_v2 = vld [vmem:[%s381_s1 + $0x8] sm:$0xff]   ;;  %v284_v8 = vld [vmem:[%s383_s3 + $0x10] sm:$0xff]  }
   0x2   :  { %266 = vmatprep.subr.bf16.mxu1 %v290_v0  ;;  %274 = vmatprep.mubr.msk.bf16.mxu1 %vm291_vm0, %v290_v0  ;;  %v27_v3 = vld [vmem:[%s382_s0] sm:$0xff]  ;;  %v28_v4 = vld [vmem:[%s382_s0 + $0x8] sm:$0xff]  ;;  %v285_v9 = vld [vmem:[%s383_s3 + $0x18] sm:$0xff]  }
   0x3   :  { %259 = vmatpush3.bf16.msra.mxu0 %v280_v1  ;;  %v282_v5 = vld [vmem:[%s383_s3] sm:$0xff]   ;;  %v283_v6 = vld [vmem:[%s383_s3 + $0x8] sm:$0xff]   ;;  %v29_v7 = vpack.c.bf16 %v28_v4, %v27_v3 }
   0x4   :  { %260 = vmatprep.subr.bf16.mxu0 %v290_v0  ;;  %267 = vmatpush3.bf16.msra.mxu1 %v282_v5  ;;  %v238_v10 = vld [vmem:[%s384_s2] ss:$0 sm:$0xff] }
   0x5   :  { %268 = vmatprep.subr.bf16.mxu1 %v290_v0  ;;  %v242_v20 = vld [vmem:[%s385_s4] ss:$0 sm:$0xff] }
   0x6   :  { %v248_v48 = vld [vmem:[%s386_s5] ss:$0 sm:$0xff] }
   0x7   :  { %261 = vmatpush3.bf16.msra.mxu0 %v281_v2  ;;  %v249_v50 = vld [vmem:[%s387_s6] ss:$0 sm:$0xff] }
   0x8   :  { %269 = vmatpush3.bf16.msra.mxu1 %v283_v6 }
   0x9   :  { %270 = vmatprep.subr.bf16.mxu1 %v290_v0 }
   0xa   :  { %263 = vmatmul.mubr.msk.bf16.vlgmr.msra.gmra.mrb[0].mxu0 %vm53_vm1, %v29_v7 }
   0xc   :  { %271 = vmatpush3.bf16.msra.mxu1 %v284_v8 }
   0xd   :  { %272 = vmatprep.subr.bf16.mxu1 %v290_v0 }
  0x10   :  { %273 = vmatpush3.bf16.msra.mxu1 %v285_v9 }
  0xdd   :  { %v91_v11 = vpop.f32.mrb[0].mxu0 }
  0xde   :  { %v92_v12 = vadd.f32 %v238_v10, %v91_v11  ;;  %v264_v13 = vpop.f32.mrb[1].mxu0 }
  0xdf   :  { %v94_v14 = vpop.f32.mrb[2].mxu0 }
  0xe0   :  { %v95_v15 = vadd.f32 %v238_v10, %v94_v14  ;;  %v265_v16 = vpop.f32.mrb[3].mxu0  ;;  %v98_v17 = vmax.f32 %v92_v12, 0.0 }
  0xe2   :  { %v99_v18 = vmax.f32 %v95_v15, 0.0 }
  0xe4   :  { %v100_v19 = vpack.c.bf16 %v99_v18, %v98_v17 }
  0xe6   :  { %275 = vmatmul.mubr.msk.bf16.vlgmr.msra.gmra.mrb[0].mxu1 %vm140_vm2, %v100_v19 }
 0x1b9   :  { %v178_v21 = vpop.f32.mrb[0].mxu1 }
 0x1ba   :  { %v179_v22 = vadd.f32 %v242_v20, %v178_v21  ;;  %v276_v23 = vpop.f32.mrb[1].mxu1 }
 0x1bb   :  { %v181_v24 = vpop.f32.mrb[2].mxu1 }
 0x1bc   :  { %v182_v25 = vadd.f32 %v242_v20, %v181_v24  ;;  %v277_v26 = vpop.f32.mrb[3].mxu1  ;;  %v185_v27 = vadd.f32 %v179_v22, %v27_v3 }
 0x1be   :  { %v187_v28 = vsel %vm53_vm1, %v185_v27, 0.0  ;;  %v186_v29 = vadd.f32 %v182_v25, %v28_v4 }
 0x1bf   :  { %188 = vadd.xlane.f32.xlu0 %v187_v28 }
 0x1c0   :  { %v190_v30 = vsel %vm53_vm1, %v186_v29, 0.0 }
 0x1c3   :  { %191 = vadd.xlane.f32.xlu0 %v190_v30 }
 0x24c   :  { %v189_v31 = vpop.xlane.xlu0 %188 }
 0x24d   :  { %v194_v32 = vmul.f32 0.03125, %v189_v31 }
 0x24f   :  { %v196_v33 = vsub.f32 %v185_v27, %v194_v32 }
 0x250   :  { %v192_v34 = vpop.xlane.xlu0 %191 }
 0x251   :  { %v195_v35 = vmul.f32 0.03125, %v192_v34  ;;  %v198_v36 = vmul.f32 %v196_v33, %v196_v33 }
 0x253   :  { %v197_v37 = vsub.f32 %v186_v29, %v195_v35  ;;  %v200_v38 = vsel %vm53_vm1, %v198_v36, 0.0 }
 0x254   :  { %201 = vadd.xlane.f32.xlu1 %v200_v38 }
 0x255   :  { %v199_v39 = vmul.f32 %v197_v37, %v197_v37 }
 0x257   :  { %v203_v40 = vsel %vm53_vm1, %v199_v39, 0.0 }
 0x258   :  { %204 = vadd.xlane.f32.xlu1 %v203_v40 }
 0x2e1   :  { %v202_v41 = vpop.xlane.xlu1 %201 }
 0x2e2   :  { %v206_v42 = vmul.f32 0.03125, %v202_v41 }
 0x2e4   :  { %v208_v43 = vadd.f32 1e-05, %v206_v42 }
 0x2e5   :  { %v205_v44 = vpop.xlane.xlu1 %204 }
 0x2e6   :  { %286 = vrsqrt.f32 %v208_v43  ;;  %v207_v45 = vmul.f32 0.03125, %v205_v44 }
 0x2e8   :  { %v209_v46 = vadd.f32 1e-05, %v207_v45 }
 0x2ea   :  { %288 = vrsqrt.f32 %v209_v46 }
 0x2f0   :  { %v287_v47 = vpop.eup %286 }
 0x2f1   :  { %v212_v49 = vmul.f32 %v287_v47, %v196_v33 }
 0x2f3   :  { %v221_v51 = vmul.f32 %v248_v48, %v212_v49 }
 0x2f4   :  { %v289_v52 = vpop.eup %288 }
 0x2f5   :  { %v230_v53 = vadd.f32 %v249_v50, %v221_v51  ;;  %v213_v54 = vmul.f32 %v289_v52, %v197_v37 }
 0x2f7   :  { %232 = vst.msk [vmem:[%s388_s7] sm:$0xff] %vm53_vm1, %v230_v53  ;;  %v222_v55 = vmul.f32 %v248_v48, %v213_v54 }
 0x2f9   :  { %v231_v56 = vadd.f32 %v249_v50, %v222_v55 }
 0x2fb   :  { %233 = vst.msk [vmem:[%s388_s7 + $0x8] sm:$0xff] %vm53_vm1, %v231_v56 }

// kernel: seq2seq_forward.27
= control target key start
LH: loop header
LB: loop body
LE: loop exit
PB: predicated region body
PF: predicated region fallthrough
CT: control target
= control target key end

     0   :  { %v181_v0 = vmov 0.0   ;;  %vm182_vm0 = vmmov 0   ;;  %vm54_vm1 = vcmask 261120   ;;  %s255_s2 = inlined_call_operand.vmem [shape: bf16[32,32], index: 2, kind: input, shape index: {}]   ;;  %s256_s0 = inlined_call_operand.vmem [shape: bf16[16,32], index: 0, kind: input, shape index: {}]   ;;  %s257_s3 = inlined_call_operand.vmem [shape: f32[1,32], index: 3, kind: input, shape index: {}]   ;;  %s258_s1 = inlined_call_operand.vmem [shape: f32[16,32], index: 1, kind: input, shape index: {}]   ;;  %s259_s4 = inlined_call_operand.vmem [shape: f32[1,32], index: 4, kind: input, shape index: {}]   ;;  %s260_s5 = inlined_call_operand.vmem [shape: f32[1,32], index: 5, kind: input, shape index: {}]   ;;  %s261_s6 = inlined_call_operand.vmem [shape: f32[16,32], index: 6, kind: output, shape index: {}]  }
   0x1   :  { %164 = vmatprep.subr.bf16.mxu0 %v181_v0  ;;  %v174_v1 = vld [vmem:[%s255_s2] sm:$0xff]   ;;  %168 = vmatprep.mubr.msk.bf16.mxu0 %vm182_vm0, %v181_v0  ;;  %v175_v2 = vld [vmem:[%s255_s2 + $0x8] sm:$0xff]  }
   0x2   :  { %165 = vmatpush3.bf16.msra.mxu0 %v174_v1  ;;  %v176_v3 = vld [vmem:[%s256_s0] sm:$0xff]   ;;  %v100_v10 = vld [vmem:[%s258_s1 + $0x8] sm:$0xff] }
   0x3   :  { %166 = vmatprep.subr.bf16.mxu0 %v181_v0  ;;  %v154_v4 = vld [vmem:[%s257_s3] ss:$0 sm:$0xff] }
   0x4   :  { %v99_v6 = vld [vmem:[%s258_s1] sm:$0xff] }
   0x5   :  { %v159_v34 = vld [vmem:[%s259_s4] ss:$0 sm:$0xff] }
   0x6   :  { %167 = vmatpush3.bf16.msra.mxu0 %v175_v2  ;;  %v160_v36 = vld [vmem:[%s260_s5] ss:$0 sm:$0xff] }
   0x9   :  { %169 = vmatmul.mubr.msk.bf16.vlgmr.msra.gmra.mrb[0].mxu0 %vm54_vm1, %v176_v3 }
  0xdc   :  { %v92_v5 = vpop.f32.mrb[0].mxu0 }
  0xdd   :  { %v93_v7 = vadd.f32 %v154_v4, %v92_v5  ;;  %v170_v8 = vpop.f32.mrb[1].mxu0 }
  0xde   :  { %v95_v9 = vpop.f32.mrb[2].mxu0 }
  0xdf   :  { %v96_v11 = vadd.f32 %v154_v4, %v95_v9  ;;  %v171_v12 = vpop.f32.mrb[3].mxu0  ;;  %v101_v13 = vadd.f32 %v99_v6, %v93_v7 }
  0xe1   :  { %v103_v14 = vsel %vm54_vm1, %v101_v13, 0.0  ;;  %v102_v15 = vadd.f32 %v100_v10, %v96_v11 }
  0xe2   :  { %104 = vadd.xlane.f32.xlu0 %v103_v14 }
  0xe3   :  { %v106_v16 = vsel %vm54_vm1, %v102_v15, 0.0 }
  0xe6   :  { %107 = vadd.xlane.f32.xlu0 %v106_v16 }
 0x16f   :  { %v105_v17 = vpop.xlane.xlu0 %104 }
 0x170   :  { %v110_v18 = vmul.f32 0.03125, %v105_v17 }
 0x172   :  { %v112_v19 = vsub.f32 %v101_v13, %v110_v18 }
 0x173   :  { %v108_v20 = vpop.xlane.xlu0 %107 }
 0x174   :  { %v111_v21 = vmul.f32 0.03125, %v108_v20  ;;  %v114_v22 = vmul.f32 %v112_v19, %v112_v19 }
 0x176   :  { %v113_v23 = vsub.f32 %v102_v15, %v111_v21  ;;  %v116_v24 = vsel %vm54_vm1, %v114_v22, 0.0 }
 0x177   :  { %117 = vadd.xlane.f32.xlu1 %v116_v24 }
 0x178   :  { %v115_v25 = vmul.f32 %v113_v23, %v113_v23 }
 0x17a   :  { %v119_v26 = vsel %vm54_vm1, %v115_v25, 0.0 }
 0x17b   :  { %120 = vadd.xlane.f32.xlu1 %v119_v26 }
 0x204   :  { %v118_v27 = vpop.xlane.xlu1 %117 }
 0x205   :  { %v122_v28 = vmul.f32 0.03125, %v118_v27 }
 0x207   :  { %v124_v29 = vadd.f32 1e-05, %v122_v28 }
 0x208   :  { %v121_v30 = vpop.xlane.xlu1 %120 }
 0x209   :  { %177 = vrsqrt.f32 %v124_v29  ;;  %v123_v31 = vmul.f32 0.03125, %v121_v30 }
 0x20b   :  { %v125_v32 = vadd.f32 1e-05, %v123_v31 }
 0x20d   :  { %179 = vrsqrt.f32 %v125_v32 }
 0x213   :  { %v178_v33 = vpop.eup %177 }
 0x214   :  { %v128_v35 = vmul.f32 %v178_v33, %v112_v19 }
 0x216   :  { %v137_v37 = vmul.f32 %v159_v34, %v128_v35 }
 0x217   :  { %v180_v38 = vpop.eup %179 }
 0x218   :  { %v146_v39 = vadd.f32 %v160_v36, %v137_v37  ;;  %v129_v40 = vmul.f32 %v180_v38, %v113_v23 }
 0x21a   :  { %148 = vst.msk [vmem:[%s261_s6] sm:$0xff] %vm54_vm1, %v146_v39  ;;  %v138_v41 = vmul.f32 %v159_v34, %v129_v40 }
 0x21c   :  { %v147_v42 = vadd.f32 %v160_v36, %v138_v41 }
 0x21e   :  { %149 = vst.msk [vmem:[%s261_s6 + $0x8] sm:$0xff] %vm54_vm1, %v147_v42 }

// kernel: seq2seq_forward.26
= control target key start
LH: loop header
LB: loop body
LE: loop exit
PB: predicated region body
PF: predicated region fallthrough
CT: control target
= control target key end

     0   :  { %s1373_s12 = smov 0   ;;  %s1550_s0 = inlined_call_operand.vmem [shape: bf16[16,96], index: 0, kind: input, shape index: {}]   ;;  %s1551_s1 = inlined_call_operand.vmem [shape: f32[8,8], index: 1, kind: input, shape index: {}]   ;;  %s1552_s2 = inlined_call_operand.vmem [shape: f32[2,1,8], index: 2, kind: input, shape index: {}]   ;;  %s1553_s3 = inlined_call_operand.vmem [shape: bf16[16,32], index: 3, kind: output, shape index: {}]  }
   0x1 LB: > { %s1196_s13 = sadd.s32 4294967295, %s1332_s12   ;;  %p1200_p0 = scmp.ge.s32.totalorder %s1332_s12, 1  ;;  %s1332_s12 = sphi %s1373_s12, %s13_s12  }
   0x2   : > { %p144_p1 = scmp.lt.s32.totalorder %s1332_s12, 3 }
   0x4   : > { %p145_p2 = pnand %p1200_p0, %p144_p1 }
   0x5   : > { %p169_p3 = scmp.lt.s32.totalorder (!%p145_p2), %s1196_s13, 1  ;;  %s1334_s18 = smov (!%p145_p2), 120   ;;  %v1340_v1 = vmov (!%p145_p2), 0.0   ;;  %vm1342_vm0 = vmmov (!%p145_p2), 0   ;;  %v253_v4 = vlaneseq (!%p145_p2)  ;;  %v1343_v7 = vmov (!%p145_p2), 1983009808  }
   0x6   : > { %148 = sbr.rel (%p145_p2) target bundleno = 1115 (0x45b), region = 32  ;;  %s1335_s19 = smov (!%p145_p2), 104   ;;  %1235 = vmatprep.subr.bf16.mxu0 (!%p145_p2), %v1340_v1  ;;  %1241 = vmatprep.subr.bf16.mxu1 (!%p145_p2), %v1340_v1  ;;  %v251_v8 = vunpack.c.l.s4 (!%p145_p2), %v1343_v7  ;;  %v1344_v16 = vmov (!%p145_p2), 1934713408   ;;  %vm539_vm1 = vcmask (!%p145_p2), 64512   ;;  %vm796_vm4 = vcmask (!%p145_p2), 1043456  }
   0x7   : > { %s1336_s20 = smov (!%p145_p2), 112   ;;  %s1337_s21 = smov (!%p145_p2), 96   ;;  %1237 = vmatprep.mubr.msk.bf16.mxu0 (!%p145_p2), %vm1342_vm0, %v1340_v1  ;;  %1243 = vmatprep.mubr.msk.bf16.mxu1 (!%p145_p2), %vm1342_vm0, %v1340_v1  ;;  %v1404_v10 = vshrl.u32 (!%p145_p2), %v253_v4, 7  ;;  %v268_v17 = vunpack.c.l.s4 (!%p145_p2), %v1344_v16  ;;  %vm1127_vm5 = vcmask (!%p145_p2), 130048   ;;  %vm1129_vm6 = vcmask (!%p145_p2), 195584  }
   0x8   : > { %s1338_s22 = smov (!%p145_p2), 88   ;;  %s1339_s23 = smov (!%p145_p2), 80   ;;  %v252_v13 = vunpack.c.0.s8 (!%p145_p2), %v251_v8  ;;  %vm1132_vm7 = vcmask (!%p145_p2), 257024  }
   0x9   : > { %s1341_s24 = smov (!%p145_p2), 72   ;;  %v269_v27 = vunpack.c.0.s8 (!%p145_p2), %v268_v17  ;;  %s1346_s30 = smov (!%p145_p2), 56  }
   0xa   : > { %v1409_v26 = vsub.s32 (!%p145_p2), %v252_v13, %v1404_v10  ;;  %s1347_s4 = smov (!%p145_p2), 64   ;;  %s1348_s5 = smov (!%p145_p2), 48  }
   0xb   : > { %v1413_v38 = vsub.s32 (!%p145_p2), %v269_v27, %v1404_v10  ;;  %s1349_s6 = smov (!%p145_p2), 40   ;;  %s1350_s7 = smov (!%p145_p2), 16  }
   0xc   : > { %s1351_s8 = smov (!%p145_p2), 8   ;;  %s1352_s9 = smov (!%p145_p2), 24  }
   0xd   : > { %s1555_s13 = smov (!%p169_p3, %s1196_s13), 1 }
   0xe   : > { %s1201_s14 = sshll.u32 %s1555_s13, 2  ;;  %s175_s27 = scalar_lea.vmem %s1552_s2, %s1555_s13 }
   0xf   : > { %s172_s17 = scalar_lea.vmem %s1550_s0, %s1201_s14  ;;  %s179_s15 = scalar_lea.vmem %s1553_s3, %s1201_s14 }
  0x10   : > { %v1389_v0 = vld [vmem:[%s172_s17] sm:$0xf] }
  0x11   : > { %183 = vrot.lane.b32.xlu0 %v1389_v0, %s1334_s18  ;;  %187 = vrot.lane.b32.xlu1 %v1389_v0, %s1335_s19  ;;  %v209_v11 = vshrl.u32 %v1389_v0, 16 }
  0x15   : > { %185 = vrot.lane.b32.xlu0 %v1389_v0, %s1336_s20  ;;  %189 = vrot.lane.b32.xlu1 %v1389_v0, %s1337_s21 }
  0x19   : > { %191 = vrot.lane.b32.xlu0 %v1389_v0, %s1338_s22  ;;  %193 = vrot.lane.b32.xlu1 %v1389_v0, %s1339_s23 }
  0x1d   : > { %195 = vrot.lane.b32.xlu0 %v1389_v0, %s1341_s24 }
  0x83   : > { %v184_v2 = vpop.permute.xlu0 %183  ;;  %v188_v3 = vpop.permute.xlu1 %187 }
  0x84   : > { %v210_v12 = vshrl.u32 %v184_v2, 16  ;;  %v207_v20 = vpack.i.b16 %v184_v2, %v1389_v0  ;;  %v218_v21 = vshrl.u32 %v188_v3, 16 }
  0x86   : > { %v211_v25 = vpack.i.b16 %v210_v12, %v209_v11 }
  0x87   : > { %v186_v5 = vpop.permute.xlu0 %185  ;;  %v190_v6 = vpop.permute.xlu1 %189 }
  0x88   : > { %v225_v9 = vshrl.u32 %v190_v6, 16  ;;  %v217_v22 = vshrl.u32 %v186_v5, 16  ;;  %v215_v29 = vpack.i.b16 %v188_v3, %v186_v5 }
  0x8a   : > { %v219_v33 = vpack.i.b16 %v218_v21, %v217_v22 }
  0x8b   : > { %v192_v14 = vpop.permute.xlu0 %191  ;;  %v194_v15 = vpop.permute.xlu1 %193 }
  0x8c   : > { %v223_v18 = vpack.i.b16 %v192_v14, %v190_v6  ;;  %v226_v19 = vshrl.u32 %v192_v14, 16  ;;  %v233_v24 = vshrl.u32 %v194_v15, 16  ;;  %v1345_v6 = vmov 0  }
  0x8e   : > { %v227_v23 = vpack.i.b16 %v226_v19, %v225_v9  ;;  %v249_v30 = vcombine.low %v207_v20, %v223_v18 }
  0x8f   : > { %v196_v28 = vpop.permute.xlu0 %195 }
  0x90   : > { %v231_v31 = vpack.i.b16 %v196_v28, %v194_v15  ;;  %v234_v32 = vshrl.u32 %v196_v28, 16  ;;  %v283_v34 = vcombine.low %v211_v25, %v227_v23  ;;  %v256_v37 = vrot.slane %v249_v30, %v1409_v26 }
  0x92   : > { %v235_v35 = vpack.i.b16 %v234_v32, %v233_v24  ;;  %v257_v36 = vcombine.low %v215_v29, %v231_v31  ;;  %v290_v41 = vrot.slane %v283_v34, %v1409_v26  ;;  %v733_v32 = vld [vmem:[%s175_s27] sm:$0x1] }
  0x93   : > { %vm734_vm2 = vcmp.gt.f32.partialorder %v733_v32, 0.5 }
  0x94   : > { %v264_v39 = vrot.slane %v257_v36, %v1409_v26  ;;  %v291_v40 = vcombine.low %v219_v33, %v235_v35  ;;  %v738_v33 = vsub.s32 0, %v1404_v10  ;;  %v735_v34 = vsel %vm734_vm2, 1, %v1345_v6 }
  0x96   : > { %v265_v42 = vcombine.low %v256_v37, %v264_v39  ;;  %v266_v43 = vcombine.high %v256_v37, %v264_v39  ;;  %v298_v44 = vrot.slane %v291_v40, %v1409_v26  ;;  %v739_v35 = vrot.slane %v735_v34, %v738_v33  ;;  %v728_v37 = vld [vmem:[%s1551_s1] sm:$0xff] }
  0x98   : > { %v273_v45 = vrot.slane %v265_v42, %v1413_v38  ;;  %v280_v46 = vrot.slane %v266_v43, %v1413_v38  ;;  %v299_v47 = vcombine.low %v290_v41, %v298_v44  ;;  %v300_v48 = vcombine.high %v290_v41, %v298_v44 }
  0x99   : > { %vm740_vm3 = vcmp.eq.s32.totalorder %v739_v35, 1 }
  0x9a   : > { %v307_v49 = vrot.slane %v299_v47, %v1413_v38  ;;  %v314_v50 = vrot.slane %v300_v48, %v1413_v38  ;;  %v385_v51 = vcombine.low %v273_v45, %v280_v46  ;;  %v1203_v52 = vcombine.high %v273_v45, %v280_v46 }
  0x9c   : > { %v392_v53 = vrot.slane %v385_v51, %v1409_v26  ;;  %v400_v54 = vrot.slane %v1203_v52, %v1409_v26  ;;  %v419_v55 = vcombine.low %v307_v49, %v314_v50  ;;  %v1204_v56 = vcombine.high %v307_v49, %v314_v50 }
  0x9e   : > { %v402_v57 = vcombine.high %v392_v53, %v400_v54  ;;  %v426_v58 = vrot.slane %v419_v55, %v1409_v26  ;;  %v434_v59 = vrot.slane %v1204_v56, %v1409_v26  ;;  %v401_v2 = vcombine.low %v392_v53, %v400_v54 }
  0xa0   : > { %v416_v60 = vrot.slane %v402_v57, %v1413_v38  ;;  %v436_v61 = vcombine.high %v426_v58, %v434_v59  ;;  %v435_v62 = vcombine.low %v426_v58, %v434_v59  ;;  %v409_v14 = vrot.slane %v401_v2, %v1413_v38 }
  0xa2   : > { %v450_v63 = vrot.slane %v436_v61, %v1413_v38  ;;  %v518_v4 = vshrl.u32 %v416_v60, 16  ;;  %v443_v11 = vrot.slane %v435_v62, %v1413_v38  ;;  %v418_v12 = vcombine.high %v416_v60, %v1345_v6 }
  0xa3   : > { %v506_v20 = vshrl.u32 %v409_v14, 16  ;;  %v417_v27 = vcombine.high %v409_v14, %v1345_v6 }
  0xa4   : > { %v517_v3 = vpack.i.b16 %v450_v63, %v416_v60  ;;  %v519_v5 = vshrl.u32 %v450_v63, 16  ;;  %v452_v7 = vcombine.high %v450_v63, %v1345_v6  ;;  %v507_v17 = vshrl.u32 %v443_v11, 16 }
  0xa5   : > { %v524_v18 = vshrl.u32 %v418_v12, 16  ;;  %v505_v19 = vpack.i.b16 %v443_v11, %v409_v14  ;;  %v451_v24 = vcombine.high %v443_v11, %v1345_v6  ;;  %v512_v30 = vshrl.u32 %v417_v27, 16 }
  0xa6   : > { %v544_v8 = vsel %vm539_vm1, %v517_v3, 0  ;;  %v520_v9 = vpack.i.b16 %v519_v5, %v518_v4  ;;  %v525_v15 = vshrl.u32 %v452_v7, 16  ;;  %v523_v16 = vpack.i.b16 %v452_v7, %v418_v12 }
  0xa7   : > { %1236 = vmatpush3.bf16.xpose.msra.mxu0 %v544_v8  ;;  %v508_v23 = vpack.i.b16 %v507_v17, %v506_v20  ;;  %v513_v28 = vshrl.u32 %v451_v24, 16  ;;  %v511_v29 = vpack.i.b16 %v451_v24, %v417_v27 }
  0xa8   : > { %v590_v13 = vsel %vm539_vm1, %v520_v9, 0  ;;  %1247 = vmatprep.subr.bf16.mxu0 %v1340_v1  ;;  %v526_v21 = vpack.i.b16 %v525_v15, %v524_v18  ;;  %v636_v22 = vsel %vm539_vm1, %v523_v16, 0 }
  0xa9   : > { %1242 = vmatpush3.bf16.xpose.msra.mxu1 %v590_v13  ;;  %v514_v31 = vpack.i.b16 %v513_v28, %v512_v30 }
  0xaa   : > { %1253 = vmatprep.subr.bf16.mxu1 %v1340_v1  ;;  %v682_v25 = vsel %vm539_vm1, %v526_v21, 0 }
  0xae   : > { %1238 = vmatmul.mubr.msk.bf16.vlgmr.msra.gmra.mrb[0].mxu0 %vm539_vm1, %v505_v19 }
  0xaf   : > { %1248 = vmatpush3.bf16.xpose.msra.mxu0 %v636_v22  ;;  %1249 = vmatprep.mubr.msk.bf16.mxu0 %vm1342_vm0, %v1340_v1 }
  0xb0   : > { %1244 = vmatmul.mubr.msk.bf16.vlgmr.msra.gmra.mrb[0].mxu1 %vm539_vm1, %v508_v23  ;;  %1259 = vmatprep.subr.bf16.mxu0 %v1340_v1 }
  0xb1   : > { %1254 = vmatpush3.bf16.xpose.msra.mxu1 %v682_v25  ;;  %1255 = vmatprep.mubr.msk.bf16.mxu1 %vm1342_vm0, %v1340_v1 }
  0xb2   : > { %1265 = vmatprep.subr.bf16.mxu1 %v1340_v1 }
  0xb6   : > { %1250 = vmatmul.mubr.msk.bf16.vlgmr.msra.gmra.mrb[4].mxu0 %vm539_vm1, %v511_v29 }
  0xb7   : > { %1261 = vmatprep.mubr.msk.bf16.mxu0 %vm1342_vm0, %v1340_v1 }
  0xb8   : > { %1256 = vmatmul.mubr.msk.bf16.vlgmr.msra.gmra.mrb[4].mxu1 %vm539_vm1, %v514_v31 }
  0xb9   : > { %1267 = vmatprep.mubr.msk.bf16.mxu1 %vm1342_vm0, %v1340_v1 }
 0x181   : > { %v580_v36 = vpop.f32.mrb[0].mxu0 }
 0x182   : > { %v724_v39 = vmul.f32 0.35355338, %v580_v36  ;;  %v1239_v40 = vpop.f32.mrb[1].mxu0 }
 0x183   : > { %v583_v41 = vpop.f32.mrb[2].mxu0  ;;  %v626_v42 = vpop.f32.mrb[0].mxu1 }
 0x184   : > { %v729_v43 = vadd.f32 %v728_v37, %v724_v39  ;;  %v725_v44 = vmul.f32 0.35355338, %v626_v42  ;;  %v1240_v45 = vpop.f32.mrb[3].mxu0  ;;  %v1245_v46 = vpop.f32.mrb[1].mxu1 }
 0x185   : > { %v629_v47 = vpop.f32.mrb[2].mxu1 }
 0x186   : > { %v730_v48 = vadd.f32 %v728_v37, %v725_v44  ;;  %v1246_v10 = vpop.f32.mrb[3].mxu1  ;;  %v741_v49 = vsel %vm740_vm3, -1e+30, %v729_v43 }
 0x187   : > { %v745_v50 = vsel %vm539_vm1, %v741_v49, -inf }
 0x188   : > { %746 = vmax.xlane.f32.xlu1 %v745_v50  ;;  %v742_v51 = vsel %vm740_vm3, -1e+30, %v730_v48 }
 0x189   : > { %v672_v52 = vpop.f32.mrb[4].mxu0  ;;  %v748_v53 = vsel %vm539_vm1, %v742_v51, -inf }
 0x18a   : > { %v726_v54 = vmul.f32 0.35355338, %v672_v52  ;;  %749 = vmax.xlane.f32.xlu0 %v748_v53  ;;  %v1251_v55 = vpop.f32.mrb[5].mxu0 }
 0x18b   : > { %v675_v56 = vpop.f32.mrb[6].mxu0  ;;  %v718_v57 = vpop.f32.mrb[4].mxu1 }
 0x18c   : > { %v731_v58 = vadd.f32 %v728_v37, %v726_v54  ;;  %v727_v59 = vmul.f32 0.35355338, %v718_v57  ;;  %v1252_v60 = vpop.f32.mrb[7].mxu0  ;;  %v1257_v61 = vpop.f32.mrb[5].mxu1 }
 0x18d   : > { %v721_v62 = vpop.f32.mrb[6].mxu1 }
 0x18e   : > { %v732_v63 = vadd.f32 %v728_v37, %v727_v59  ;;  %v1258_v2 = vpop.f32.mrb[7].mxu1  ;;  %v743_v3 = vsel %vm740_vm3, -1e+30, %v731_v58 }
 0x18f   : > { %v751_v4 = vsel %vm539_vm1, %v743_v3, -inf }
 0x190   : > { %752 = vmax.xlane.f32.xlu0 %v751_v4  ;;  %v744_v5 = vsel %vm740_vm3, -1e+30, %v732_v63 }
 0x191   : > { %v754_v7 = vsel %vm539_vm1, %v744_v5, -inf }
 0x192   : > { %755 = vmax.xlane.f32.xlu1 %v754_v7 }
 0x1a3   : > { %199 = vrot.lane.b32.xlu1 %v1389_v0, %s1346_s30 }
 0x1a6   : > { %197 = vrot.lane.b32.xlu0 %v1389_v0, %s1347_s4 }
 0x215   : > { %v747_v8 = vpop.xlane.xlu1 %746 }
 0x216   : > { %v757_v9 = vsub.f32 %v741_v49, %v747_v8 }
 0x217   : > { %v750_v11 = vpop.xlane.xlu0 %749 }
 0x218   : > { %v761_v12 = vmul.f32 1.442695, %v757_v9  ;;  %v758_v13 = vsub.f32 %v742_v51, %v750_v11 }
 0x21a   : > { %1310 = vpow2.f32 %v761_v12  ;;  %v763_v14 = vmul.f32 1.442695, %v758_v13 }
 0x21c   : > { %1312 = vpow2.f32 %v763_v14 }
 0x21d   : > { %v753_v20 = vpop.xlane.xlu0 %752 }
 0x21e   : > { %v759_v22 = vsub.f32 %v743_v3, %v753_v20 }
 0x21f   : > { %v756_v19 = vpop.xlane.xlu1 %755 }
 0x220   : > { %v760_v21 = vsub.f32 %v744_v5, %v756_v19  ;;  %v765_v24 = vmul.f32 1.442695, %v759_v22 }
 0x222   : > { %v767_v23 = vmul.f32 1.442695, %v760_v21 }
 0x223   : > { %v200_v30 = vpop.permute.xlu1 %199 }
 0x224   : > { %v1473_v15 = vpop.eup %1310  ;;  %1314 = vpow2.f32 %v767_v23  ;;  %v241_v32 = vshrl.u32 %v200_v30, 16 }
 0x225   : > { %v769_v16 = vsel %vm539_vm1, %v1473_v15, 0.0  ;;  %1316 = vpow2.f32 %v765_v24 }
 0x226   : > { %v1477_v17 = vpop.eup %1312  ;;  %770 = vadd.xlane.f32.xlu0 %v769_v16 }
 0x227   : > { %v772_v18 = vsel %vm539_vm1, %v1477_v17, 0.0 }
 0x228   : > { %773 = vadd.xlane.f32.xlu1 %v772_v18 }
 0x22e   : > { %v1483_v25 = vpop.eup %1314 }
 0x22f   : > { %v1485_v27 = vpop.eup %1316  ;;  %v778_v28 = vsel %vm539_vm1, %v1483_v25, 0.0 }
 0x230   : > { %v775_v29 = vsel %vm539_vm1, %v1485_v27, 0.0 }
 0x239   : > { %201 = vrot.lane.b32.xlu1 %v1389_v0, %s1348_s5 }
 0x23c   : > { %203 = vrot.lane.b32.xlu0 %v1389_v0, %s1349_s6  ;;  %v198_v0 = vpop.permute.xlu0 %197 }
 0x23d   : > { %v240_v33 = vshrl.u32 %v198_v0, 16  ;;  %v239_v36 = vpack.i.b16 %v200_v30, %v198_v0 }
 0x23f   : > { %v242_v37 = vpack.i.b16 %v241_v32, %v240_v33  ;;  %v324_v43 = vrot.slane %v239_v36, %v1409_v26 }
 0x241   : > { %v358_v46 = vrot.slane %v242_v37, %v1409_v26 }
 0x25b   : > { %779 = vadd.xlane.f32.xlu0 %v778_v28 }
 0x25d   : > { %776 = vadd.xlane.f32.xlu1 %v775_v29 }
 0x2b3   : > { %v771_v31 = vpop.xlane.xlu0 %770 }
 0x2b4   : > { %1318 = vrcp.f32 %v771_v31 }
 0x2b5   : > { %v774_v34 = vpop.xlane.xlu1 %773 }
 0x2b6   : > { %1320 = vrcp.f32 %v774_v34 }
 0x2b7   : > { %v204_v35 = vpop.permute.xlu0 %203 }
 0x2b8   : > { %v247_v40 = vshrl.u32 %v204_v35, 16 }
 0x2b9   : > { %v202_v39 = vpop.permute.xlu1 %201 }
 0x2ba   : > { %v245_v41 = vpack.i.b16 %v204_v35, %v202_v39  ;;  %v246_v42 = vshrl.u32 %v202_v39, 16 }
 0x2bc   : > { %v248_v44 = vpack.i.b16 %v247_v40, %v246_v42  ;;  %v332_v45 = vrot.slane %v245_v41, %v1409_v26 }
 0x2be   : > { %v333_v47 = vcombine.low %v324_v43, %v332_v45  ;;  %v334_v48 = vcombine.high %v324_v43, %v332_v45  ;;  %v366_v10 = vrot.slane %v248_v44, %v1409_v26  ;;  %v1319_v2 = vpop.eup %1318 }
 0x2bf   : > { %v785_v9 = vmul.f32 %v1319_v2, %v1473_v15 }
 0x2c0   : > { %v341_v49 = vrot.slane %v333_v47, %v1413_v38  ;;  %v348_v50 = vrot.slane %v334_v48, %v1413_v38  ;;  %v367_v51 = vcombine.low %v358_v46, %v366_v10  ;;  %v368_v52 = vcombine.high %v358_v46, %v366_v10  ;;  %v1321_v5 = vpop.eup %1320 }
 0x2c1   : > { %v786_v16 = vmul.f32 %v1321_v5, %v1477_v17  ;;  %v789_v24 = vpack.c.bf16 %v785_v9, %v785_v9 }
 0x2c2   : > { %v375_v53 = vrot.slane %v367_v51, %v1413_v38  ;;  %v382_v54 = vrot.slane %v368_v52, %v1413_v38  ;;  %v453_v55 = vcombine.low %v341_v49, %v348_v50  ;;  %v1205_v56 = vcombine.high %v341_v49, %v348_v50 }
 0x2c3   : > { %v790_v28 = vpack.c.bf16 %v786_v16, %v786_v16 }
 0x2c4   : > { %v460_v57 = vrot.slane %v453_v55, %v1409_v26  ;;  %v468_v58 = vrot.slane %v1205_v56, %v1409_v26  ;;  %v478_v59 = vcombine.low %v375_v53, %v382_v54  ;;  %v1206_v60 = vcombine.high %v375_v53, %v382_v54 }
 0x2c6   : > { %v485_v61 = vrot.slane %v478_v59, %v1409_v26  ;;  %v493_v62 = vrot.slane %v1206_v60, %v1409_v26  ;;  %v469_v63 = vcombine.low %v460_v57, %v468_v58 }
 0x2c8   : > { %v476_v3 = vrot.slane %v469_v63, %v1413_v38  ;;  %v494_v4 = vcombine.low %v485_v61, %v493_v62 }
 0x2ca   : > { %v501_v7 = vrot.slane %v494_v4, %v1413_v38  ;;  %v477_v8 = vcombine.high %v476_v3, %v1345_v6  ;;  %v530_v12 = vshrl.u32 %v476_v3, 16 }
 0x2cc   : > { %v529_v11 = vpack.i.b16 %v501_v7, %v476_v3  ;;  %v531_v13 = vshrl.u32 %v501_v7, 16  ;;  %v502_v14 = vcombine.high %v501_v7, %v1345_v6  ;;  %v536_v18 = vshrl.u32 %v477_v8, 16 }
 0x2ce   : > { %v798_v19 = vsel %vm796_vm4, %v529_v11, 0  ;;  %v532_v20 = vpack.i.b16 %v531_v13, %v530_v12  ;;  %v535_v21 = vpack.i.b16 %v502_v14, %v477_v8  ;;  %v537_v22 = vshrl.u32 %v502_v14, 16 }
 0x2cf   : > { %1260 = vmatpush3.bf16.msra.mxu0 %v798_v19 }
 0x2d0   : > { %v844_v23 = vsel %vm796_vm4, %v532_v20, 0  ;;  %1271 = vmatprep.subr.bf16.mxu0 %v1340_v1  ;;  %v538_v15 = vpack.i.b16 %v537_v22, %v536_v18  ;;  %v890_v6 = vsel %vm796_vm4, %v535_v21, 0 }
 0x2d1   : > { %1266 = vmatpush3.bf16.msra.mxu1 %v844_v23 }
 0x2d2   : > { %1262 = vmatmul.mubr.msk.bf16.vlgmr.msra.gmra.mrb[8].mxu0 %vm539_vm1, %v789_v24  ;;  %1277 = vmatprep.subr.bf16.mxu1 %v1340_v1  ;;  %v936_v17 = vsel %vm796_vm4, %v538_v15, 0 }
 0x2d3   : > { %1272 = vmatpush3.bf16.msra.mxu0 %v890_v6  ;;  %1273 = vmatprep.mubr.msk.bf16.mxu0 %vm1342_vm0, %v1340_v1 }
 0x2d4   : > { %1268 = vmatmul.mubr.msk.bf16.vlgmr.msra.gmra.mrb[8].mxu1 %vm539_vm1, %v790_v28 }
 0x2d5   : > { %1278 = vmatpush3.bf16.msra.mxu1 %v936_v17  ;;  %1279 = vmatprep.mubr.msk.bf16.mxu1 %vm1342_vm0, %v1340_v1 }
 0x2e8   : > { %v780_v29 = vpop.xlane.xlu0 %779 }
 0x2e9   : > { %1322 = vrcp.f32 %v780_v29 }
 0x2ea   : > { %v777_v0 = vpop.xlane.xlu1 %776 }
 0x2eb   : > { %1324 = vrcp.f32 %v777_v0 }
 0x2f3   : > { %v1323_v30 = vpop.eup %1322 }
 0x2f4   : > { %v788_v31 = vmul.f32 %v1323_v30, %v1483_v25 }
 0x2f5   : > { %v1325_v32 = vpop.eup %1324 }
 0x2f6   : > { %v787_v33 = vmul.f32 %v1325_v32, %v1485_v27  ;;  %v792_v34 = vpack.c.bf16 %v788_v31, %v788_v31 }
 0x2f8   : > { %1280 = vmatmul.mubr.msk.bf16.vlgmr.msra.gmra.mrb[12].mxu1 %vm539_vm1, %v792_v34  ;;  %v791_v35 = vpack.c.bf16 %v787_v33, %v787_v33 }
 0x2fa   : > { %1274 = vmatmul.mubr.msk.bf16.vlgmr.msra.gmra.mrb[12].mxu0 %vm539_vm1, %v791_v35 }
 0x3a5   : > { %v834_v36 = vpop.f32.mrb[8].mxu0 }
 0x3a6   : > { %v1263_v37 = vpop.f32.mrb[9].mxu0 }
 0x3a7   : > { %v837_v39 = vpop.f32.mrb[10].mxu0  ;;  %v880_v1 = vpop.f32.mrb[8].mxu1 }
 0x3a8   : > { %v1264_v40 = vpop.f32.mrb[11].mxu0  ;;  %v1269_v41 = vpop.f32.mrb[9].mxu1 }
 0x3a9   : > { %v883_v42 = vpop.f32.mrb[10].mxu1 }
 0x3aa   : > { %v1270_v43 = vpop.f32.mrb[11].mxu1 }
 0x3cb   : > { %v972_v44 = vpop.f32.mrb[12].mxu1 }
 0x3cc   : > { %v994_v45 = vcombine.low %v880_v1, %v972_v44  ;;  %v995_v25 = vcombine.high %v880_v1, %v972_v44  ;;  %v1281_v46 = vpop.f32.mrb[13].mxu1 }
 0x3cd   : > { %v926_v47 = vpop.f32.mrb[12].mxu0  ;;  %v975_v27 = vpop.f32.mrb[14].mxu1 }
 0x3ce   : > { %v978_v48 = vcombine.low %v834_v36, %v926_v47  ;;  %v979_v10 = vcombine.high %v834_v36, %v926_v47  ;;  %v1275_v49 = vpop.f32.mrb[13].mxu0  ;;  %v1282_v50 = vpop.f32.mrb[15].mxu1  ;;  %v1002_v52 = vrot.slane %v994_v45, %v1409_v26  ;;  %v1009_v53 = vrot.slane %v995_v25, %v1409_v26 }
 0x3cf   : > { %v929_v51 = vpop.f32.mrb[14].mxu0 }
 0x3d0   : > { %v986_v54 = vrot.slane %v978_v48, %v1409_v26  ;;  %v993_v55 = vrot.slane %v979_v10, %v1409_v26  ;;  %v1276_v56 = vpop.f32.mrb[15].mxu0 }
 0x3d2   : > { %v1010_v57 = vcombine.low %v986_v54, %v1002_v52  ;;  %v1011_v58 = vcombine.high %v986_v54, %v1002_v52  ;;  %v1026_v59 = vcombine.low %v993_v55, %v1009_v53  ;;  %v1027_v60 = vcombine.high %v993_v55, %v1009_v53 }
 0x3d4   : > { %v1018_v61 = vrot.slane %v1010_v57, %v1413_v38  ;;  %v1025_v62 = vrot.slane %v1011_v58, %v1413_v38  ;;  %v1034_v63 = vrot.slane %v1026_v59, %v1413_v38  ;;  %v1041_v2 = vrot.slane %v1027_v60, %v1413_v38 }
 0x3d6   : > { %v1046_v3 = vcombine.low %v1018_v61, %v1025_v62  ;;  %v1215_v4 = vcombine.high %v1018_v61, %v1025_v62  ;;  %v1062_v5 = vcombine.low %v1034_v63, %v1041_v2  ;;  %v1216_v7 = vcombine.high %v1034_v63, %v1041_v2 }
 0x3d8   : > { %v1053_v8 = vrot.slane %v1046_v3, %v1409_v26  ;;  %v1061_v9 = vrot.slane %v1215_v4, %v1409_v26  ;;  %v1069_v11 = vrot.slane %v1062_v5, %v1409_v26  ;;  %v1077_v12 = vrot.slane %v1216_v7, %v1409_v26 }
 0x3da   : > { %v1079_v13 = vcombine.high %v1053_v8, %v1061_v9  ;;  %v1095_v14 = vcombine.high %v1069_v11, %v1077_v12  ;;  %v1078_v16 = vcombine.low %v1053_v8, %v1061_v9  ;;  %v1094_v18 = vcombine.low %v1069_v11, %v1077_v12 }
 0x3dc   : > { %v1093_v19 = vrot.slane %v1079_v13, %v1413_v38  ;;  %v1109_v20 = vrot.slane %v1095_v14, %v1413_v38  ;;  %v1086_v21 = vrot.slane %v1078_v16, %v1413_v38  ;;  %v1102_v22 = vrot.slane %v1094_v18, %v1413_v38 }
 0x3de   : > { %v1112_v23 = vcombine.low %v1093_v19, %v1109_v20  ;;  %v1111_v24 = vcombine.high %v1086_v21, %v1102_v22  ;;  %v1113_v15 = vcombine.high %v1093_v19, %v1109_v20  ;;  %v1110_v6 = vcombine.low %v1086_v21, %v1102_v22 }
 0x3e0   : > { %1119 = vrot.lane.b32.xlu1 %v1112_v23, %s1350_s7  ;;  %1115 = vrot.lane.b32.xlu0 %v1111_v24, %s1351_s8 }
 0x3e4   : > { %1123 = vrot.lane.b32.xlu1 %v1113_v15, %s1352_s9 }
 0x452   : > { %v1120_v26 = vpop.permute.xlu1 %1119  ;;  %v1116_v28 = vpop.permute.xlu0 %1115 }
 0x453   : > { %v1126_v17 = vsel %vm539_vm1, %v1110_v6, %v1116_v28 }
 0x454   : > { %v1128_v0 = vsel %vm1127_vm5, %v1126_v17, %v1120_v26 }
 0x456   : > { %v1124_v29 = vpop.permute.xlu1 %1123 }
 0x457   : > { %v1130_v38 = vsel %vm1129_vm6, %v1128_v0, %v1124_v29 }
 0x458   : > { %v1131_v30 = vpack.c.bf16 %v1130_v38, %v1130_v38 }
 0x45a   : > { %1133 = vst.msk [vmem:[%s179_s15] sm:$0xf] %vm1132_vm7, %v1131_v30 }
 0x45b PF: > { %s13_s12 = sadd.s32 1, %s1332_s12  }
 0x45c   : > { %p10_p4 = scmp.ge.s32.totalorder %s13_s12, 4  }
 0x45e   :  { %12 = sbr.rel (!%p10_p4) target bundleno = 1 (0x1), region = 65 }

// kernel: seq2seq_forward.37
= control target key start
LH: loop header
LB: loop body
LE: loop exit
PB: predicated region body
PF: predicated region fallthrough
CT: control target
= control target key end

     0   :  { %vm19_vm0 = vcmask 523264   ;;  %v145_v0 = vmov 0.0   ;;  %vm146_vm1 = vmmov 0   ;;  %vm43_vm2 = vcmask 261120   ;;  %s192_s1 = inlined_call_operand.vmem [shape: bf16[32,64], index: 1, kind: input, shape index: {}]   ;;  %s193_s0 = inlined_call_operand.vmem [shape: f32[16,32], index: 0, kind: input, shape index: {}]   ;;  %s194_s2 = inlined_call_operand.vmem [shape: f32[1,64], index: 2, kind: input, shape index: {}]   ;;  %s195_s3 = inlined_call_operand.vmem [shape: bf16[16,64], index: 3, kind: output, shape index: {}]  }
   0x1   :  { %133 = vmatprep.subr.bf16.mxu0 %v145_v0  ;;  %v143_v1 = vld [vmem:[%s192_s1] sm:$0xff]   ;;  %137 = vmatprep.mubr.msk.bf16.mxu0 %vm146_vm1, %v145_v0  ;;  %20 = vst.msk [vmem:[#allocation2] sm:$0xff] %vm19_vm0, %v145_v0  ;;  %21 = vst.msk [vmem:[#allocation2 + $0x8] sm:$0xff] %vm19_vm0, %v145_v0  ;;  %v144_v2 = vld [vmem:[%s192_s1 + $0x8] sm:$0xff]   ;;  %vm115_vm3 = vcmask 519168  }
   0x2   :  { %134 = vmatpush3.bf16.msra.mxu0 %v143_v1  ;;  %v24_v3 = vld [vmem:[%s193_s0] sm:$0xff]  ;;  %v25_v4 = vld [vmem:[%s193_s0 + $0x8] sm:$0xff] }
   0x3   :  { %135 = vmatprep.subr.bf16.mxu0 %v145_v0  ;;  %v26_v5 = vpack.c.bf16 %v25_v4, %v24_v3  ;;  %v125_v14 = vld [vmem:[%s194_s2] ss:$0 sm:$0xff] }
   0x6   :  { %136 = vmatpush3.bf16.msra.mxu0 %v144_v2 }
   0x8   :  { %v22_v6 = vld [vmem:[#allocation2] sm:$0xff]  ;;  %v23_v8 = vld [vmem:[#allocation2 + $0x8] sm:$0xff] }
   0x9   :  { %138 = vmatmul.mubr.msk.bf16.vlgmr.msra.gmra.mrb[0].mxu0 %vm43_vm2, %v26_v5 }
  0xdc   :  { %v81_v7 = vpop.f32.mrb[0].mxu0 }
  0xdd   :  { %v88_v9 = vadd.f32 %v81_v7, %v22_v6  ;;  %v139_v10 = vpop.f32.mrb[1].mxu0 }
  0xde   :  { %v84_v11 = vpop.f32.mrb[2].mxu0 }
  0xdf   :  { %91 = vst.msk [vmem:[#allocation2] sm:$0xff] %vm19_vm0, %v88_v9  ;;  %v89_v12 = vadd.f32 %v84_v11, %v23_v8  ;;  %v140_v13 = vpop.f32.mrb[3].mxu0 }
  0xe1   :  { %92 = vst.msk [vmem:[#allocation2 + $0x8] sm:$0xff] %vm19_vm0, %v89_v12 }
  0xe6   :  { %v96_v15 = vld [vmem:[#allocation2] sm:$0xff] }
  0xe7   :  { %v105_v16 = vadd.f32 %v125_v14, %v96_v15 }
  0xe8   :  { %v97_v17 = vld [vmem:[#allocation2 + $0x8] sm:$0xff] }
  0xe9   :  { %v128_v18 = vpack.c.bf16 %v105_v16, %v105_v16  ;;  %v106_v19 = vadd.f32 %v125_v14, %v97_v17 }
  0xeb   :  { %116 = vst.msk [vmem:[%s195_s3] sm:$0xf] %vm115_vm3, %v128_v18  ;;  %v129_v20 = vpack.c.bf16 %v106_v19, %v106_v19 }
  0xed   :  { %117 = vst.msk [vmem:[%s195_s3 + $0x4] sm:$0xf] %vm115_vm3, %v129_v20 }

// kernel: seq2seq_forward.36
= control target key start
LH: loop header
LB: loop body
LE: loop exit
PB: predicated region body
PF: predicated region fallthrough
CT: control target
= control target key end

     0   :  { %vm19_vm0 = vcmask 261120   ;;  %v144_v0 = vmov 0.0   ;;  %vm145_vm1 = vmmov 0   ;;  %vm114_vm2 = vcmask 257024   ;;  %s192_s1 = inlined_call_operand.vmem [shape: bf16[32,32], index: 1, kind: input, shape index: {}]   ;;  %s193_s0 = inlined_call_operand.vmem [shape: f32[16,32], index: 0, kind: input, shape index: {}]   ;;  %s194_s2 = inlined_call_operand.vmem [shape: f32[1,32], index: 2, kind: input, shape index: {}]   ;;  %s195_s3 = inlined_call_operand.vmem [shape: bf16[16,32], index: 3, kind: output, shape index: {}]  }
   0x1   :  { %132 = vmatprep.subr.bf16.mxu0 %v144_v0  ;;  %v142_v1 = vld [vmem:[%s192_s1] sm:$0xff]   ;;  %136 = vmatprep.mubr.msk.bf16.mxu0 %vm145_vm1, %v144_v0  ;;  %20 = vst.msk [vmem:[#allocation2] sm:$0xff] %vm19_vm0, %v144_v0  ;;  %21 = vst.msk [vmem:[#allocation2 + $0x8] sm:$0xff] %vm19_vm0, %v144_v0  ;;  %v143_v2 = vld [vmem:[%s192_s1 + $0x8] sm:$0xff]  }
   0x2   :  { %133 = vmatpush3.bf16.msra.mxu0 %v142_v1  ;;  %v24_v3 = vld [vmem:[%s193_s0] sm:$0xff]  ;;  %v25_v4 = vld [vmem:[%s193_s0 + $0x8] sm:$0xff] }
   0x3   :  { %134 = vmatprep.subr.bf16.mxu0 %v144_v0  ;;  %v26_v5 = vpack.c.bf16 %v25_v4, %v24_v3  ;;  %v124_v14 = vld [vmem:[%s194_s2] ss:$0 sm:$0xff] }
   0x6   :  { %135 = vmatpush3.bf16.msra.mxu0 %v143_v2 }
   0x8   :  { %v22_v6 = vld [vmem:[#allocation2] sm:$0xff]  ;;  %v23_v8 = vld [vmem:[#allocation2 + $0x8] sm:$0xff] }
   0x9   :  { %137 = vmatmul.mubr.msk.bf16.vlgmr.msra.gmra.mrb[0].mxu0 %vm19_vm0, %v26_v5 }
  0xdc   :  { %v81_v7 = vpop.f32.mrb[0].mxu0 }
  0xdd   :  { %v88_v9 = vadd.f32 %v81_v7, %v22_v6  ;;  %v138_v10 = vpop.f32.mrb[1].mxu0 }
  0xde   :  { %v84_v11 = vpop.f32.mrb[2].mxu0 }
  0xdf   :  { %90 = vst.msk [vmem:[#allocation2] sm:$0xff] %vm19_vm0, %v88_v9  ;;  %v89_v12 = vadd.f32 %v84_v11, %v23_v8  ;;  %v139_v13 = vpop.f32.mrb[3].mxu0 }
  0xe1   :  { %91 = vst.msk [vmem:[#allocation2 + $0x8] sm:$0xff] %vm19_vm0, %v89_v12 }
  0xe6   :  { %v95_v15 = vld [vmem:[#allocation2] sm:$0xff] }
  0xe7   :  { %v104_v16 = vadd.f32 %v124_v14, %v95_v15 }
  0xe8   :  { %v96_v17 = vld [vmem:[#allocation2 + $0x8] sm:$0xff] }
  0xe9   :  { %v127_v18 = vpack.c.bf16 %v104_v16, %v104_v16  ;;  %v105_v19 = vadd.f32 %v124_v14, %v96_v17 }
  0xeb   :  { %115 = vst.msk [vmem:[%s195_s3] sm:$0xf] %vm114_vm2, %v127_v18  ;;  %v128_v20 = vpack.c.bf16 %v105_v19, %v105_v19 }
  0xed   :  { %116 = vst.msk [vmem:[%s195_s3 + $0x4] sm:$0xf] %vm114_vm2, %v128_v20 }

// kernel: seq2seq_forward.49
= control target key start
LH: loop header
LB: loop body
LE: loop exit
PB: predicated region body
PF: predicated region fallthrough
CT: control target
= control target key end

     0   :  { %vm19_vm0 = vcmask 490496   ;;  %v132_v0 = vmov 0.0   ;;  %vm133_vm1 = vmmov 0   ;;  %vm43_vm2 = vcmask 261120   ;;  %s181_s1 = inlined_call_operand.vmem [shape: bf16[32,60], index: 1, kind: input, shape index: {}]   ;;  %s182_s0 = inlined_call_operand.vmem [shape: f32[16,32], index: 0, kind: input, shape index: {}]   ;;  %s183_s2 = inlined_call_operand.vmem [shape: f32[1,60], index: 2, kind: input, shape index: {}]   ;;  %s184_s3 = inlined_call_operand.vmem [shape: f32[16,60], index: 3, kind: output, shape index: {}]  }
   0x1   :  { %120 = vmatprep.subr.bf16.mxu0 %v132_v0  ;;  %v130_v1 = vld [vmem:[%s181_s1] sm:$0xff]   ;;  %124 = vmatprep.mubr.msk.bf16.mxu0 %vm133_vm1, %v132_v0  ;;  %20 = vst.msk [vmem:[#allocation2] sm:$0xff] %vm19_vm0, %v132_v0  ;;  %21 = vst.msk [vmem:[#allocation2 + $0x8] sm:$0xff] %vm19_vm0, %v132_v0  ;;  %v131_v2 = vld [vmem:[%s181_s1 + $0x8] sm:$0xff]  }
   0x2   :  { %121 = vmatpush3.bf16.msra.mxu0 %v130_v1  ;;  %v24_v3 = vld [vmem:[%s182_s0] sm:$0xff]  ;;  %v25_v4 = vld [vmem:[%s182_s0 + $0x8] sm:$0xff] }
   0x3   :  { %122 = vmatprep.subr.bf16.mxu0 %v132_v0  ;;  %v26_v5 = vpack.c.bf16 %v25_v4, %v24_v3  ;;  %v116_v14 = vld [vmem:[%s183_s2] ss:$0 sm:$0xff] }
   0x6   :  { %123 = vmatpush3.bf16.msra.mxu0 %v131_v2 }
   0x8   :  { %v22_v6 = vld [vmem:[#allocation2] sm:$0xff]  ;;  %v23_v8 = vld [vmem:[#allocation2 + $0x8] sm:$0xff] }
   0x9   :  { %125 = vmatmul.mubr.msk.bf16.vlgmr.msra.gmra.mrb[0].mxu0 %vm43_vm2, %v26_v5 }
  0xdc   :  { %v81_v7 = vpop.f32.mrb[0].mxu0 }
  0xdd   :  { %v88_v9 = vadd.f32 %v81_v7, %v22_v6  ;;  %v126_v10 = vpop.f32.mrb[1].mxu0 }
  0xde   :  { %v84_v11 = vpop.f32.mrb[2].mxu0 }
  0xdf   :  { %91 = vst.msk [vmem:[#allocation2] sm:$0xff] %vm19_vm0, %v88_v9  ;;  %v89_v12 = vadd.f32 %v84_v11, %v23_v8  ;;  %v127_v13 = vpop.f32.mrb[3].mxu0 }
  0xe1   :  { %92 = vst.msk [vmem:[#allocation2 + $0x8] sm:$0xff] %vm19_vm0, %v89_v12 }
  0xe6   :  { %v96_v15 = vld [vmem:[#allocation2] sm:$0xff] }
  0xe7   :  { %v105_v16 = vadd.f32 %v116_v14, %v96_v15 }
  0xe8   :  { %v97_v17 = vld [vmem:[#allocation2 + $0x8] sm:$0xff] }
  0xe9   :  { %107 = vst.msk [vmem:[%s184_s3] sm:$0xff] %vm19_vm0, %v105_v16  ;;  %v106_v18 = vadd.f32 %v116_v14, %v97_v17 }
  0xeb   :  { %108 = vst.msk [vmem:[%s184_s3 + $0x8] sm:$0xff] %vm19_vm0, %v106_v18 }

// kernel: seq2seq_forward.38
= control target key start
LH: loop header
LB: loop body
LE: loop exit
PB: predicated region body
PF: predicated region fallthrough
CT: control target
= control target key end

     0   :  { %s1395_s12 = smov 0   ;;  %s1552_s0 = inlined_call_operand.vmem [shape: bf16[16,32], index: 0, kind: input, shape index: {}]   ;;  %s1553_s1 = inlined_call_operand.vmem [shape: bf16[16,64], index: 1, kind: input, shape index: {}]   ;;  %s1554_s2 = inlined_call_operand.vmem [shape: f32[2,1,8], index: 2, kind: input, shape index: {}]   ;;  %s1555_s3 = inlined_call_operand.vmem [shape: bf16[16,32], index: 3, kind: output, shape index: {}]  }
   0x1 LB: > { %s1227_s13 = sadd.s32 4294967295, %s1358_s12   ;;  %p1231_p0 = scmp.ge.s32.totalorder %s1358_s12, 1  ;;  %s1358_s12 = sphi %s1395_s12, %s13_s12  }
   0x2   : > { %p153_p1 = scmp.lt.s32.totalorder %s1358_s12, 3 }
   0x4   : > { %p154_p2 = pnand %p1231_p0, %p153_p1 }
   0x5   : > { %p182_p3 = scmp.lt.s32.totalorder (!%p154_p2), %s1227_s13, 1  ;;  %s1360_s18 = smov (!%p154_p2), 104   ;;  %v1367_v2 = vmov (!%p154_p2), 0.0   ;;  %vm1368_vm0 = vmmov (!%p154_p2), 0   ;;  %v1369_v3 = vmov (!%p154_p2), 1983009808   ;;  %v222_v5 = vlaneseq (!%p154_p2) }
   0x6   : > { %157 = sbr.rel (%p154_p2) target bundleno = 1073 (0x431), region = 32  ;;  %s1361_s19 = smov (!%p154_p2), 120   ;;  %1265 = vmatprep.subr.bf16.mxu0 (!%p154_p2), %v1367_v2  ;;  %1271 = vmatprep.subr.bf16.mxu1 (!%p154_p2), %v1367_v2  ;;  %v220_v4 = vunpack.c.l.s4 (!%p154_p2), %v1369_v3  ;;  %v1370_v10 = vmov (!%p154_p2), 1934713408   ;;  %v1371_v39 = vmov (!%p154_p2), 0   ;;  %vm563_vm1 = vcmask (!%p154_p2), 64512  }
   0x7   : > { %s1362_s20 = smov (!%p154_p2), 96   ;;  %s1363_s21 = smov (!%p154_p2), 112   ;;  %1267 = vmatprep.mubr.msk.bf16.mxu0 (!%p154_p2), %vm1368_vm0, %v1367_v2  ;;  %1273 = vmatprep.mubr.msk.bf16.mxu1 (!%p154_p2), %vm1368_vm0, %v1367_v2  ;;  %v1422_v9 = vshrl.u32 (!%p154_p2), %v222_v5, 7  ;;  %v237_v11 = vunpack.c.l.s4 (!%p154_p2), %v1370_v10  ;;  %vm815_vm2 = vcmask (!%p154_p2), 1043456   ;;  %vm1146_vm5 = vcmask (!%p154_p2), 130048  }
   0x8   : > { %s1364_s25 = smov (!%p154_p2), 80   ;;  %s1365_s26 = smov (!%p154_p2), 88   ;;  %v221_v8 = vunpack.c.0.s8 (!%p154_p2), %v220_v4  ;;  %vm1148_vm6 = vcmask (!%p154_p2), 195584   ;;  %vm1151_vm7 = vcmask (!%p154_p2), 257024  }
   0x9   : > { %s1366_s27 = smov (!%p154_p2), 72   ;;  %v238_v16 = vunpack.c.0.s8 (!%p154_p2), %v237_v11  ;;  %s1372_s4 = smov (!%p154_p2), 16  }
   0xa   : > { %v1425_v14 = vsub.s32 (!%p154_p2), %v221_v8, %v1422_v9  ;;  %s1373_s5 = smov (!%p154_p2), 8   ;;  %s1374_s6 = smov (!%p154_p2), 24  }
   0xb   : > { %v1429_v21 = vsub.s32 (!%p154_p2), %v238_v16, %v1422_v9 }
   0xd   : > { %s1557_s13 = smov (!%p182_p3, %s1227_s13), 1 }
   0xe   : > { %s1406_s14 = sshll.u32 %s1557_s13, 2  ;;  %s192_s30 = scalar_lea.vmem %s1554_s2, %s1557_s13 }
   0xf   : > { %s189_s17 = scalar_lea.vmem %s1553_s1, %s1406_s14  ;;  %s185_s24 = scalar_lea.vmem %s1552_s0, %s1406_s14 }
  0x10   : > { %v348_v0 = vld [vmem:[%s189_s17] sm:$0xf]  ;;  %s196_s9 = scalar_lea.vmem %s1555_s3, %s1406_s14 }
  0x11   : > { %356 = vrot.lane.b32.xlu1 %v348_v0, %s1360_s18  ;;  %350 = vrot.lane.b32.xlu0 %v348_v0, %s1361_s19  ;;  %v198_v1 = vld [vmem:[%s185_s24] sm:$0xf] }
  0x12   : > { %v209_v26 = vshrl.u32 %v198_v1, 16 }
  0x15   : > { %359 = vrot.lane.b32.xlu1 %v348_v0, %s1362_s20  ;;  %353 = vrot.lane.b32.xlu0 %v348_v0, %s1363_s21 }
  0x19   : > { %365 = vrot.lane.b32.xlu1 %v348_v0, %s1364_s25  ;;  %362 = vrot.lane.b32.xlu0 %v348_v0, %s1365_s26 }
  0x1d   : > { %368 = vrot.lane.b32.xlu0 %v348_v0, %s1366_s27  ;;  %200 = vrot.lane.b32.xlu1 %v198_v1, %s1361_s19 }
  0x21   : > { %202 = vrot.lane.b32.xlu0 %v198_v1, %s1363_s21  ;;  %204 = vrot.lane.b32.xlu1 %v198_v1, %s1360_s18 }
  0x83   : > { %v357_v6 = vpop.permute.xlu1 %356  ;;  %v351_v7 = vpop.permute.xlu0 %350 }
  0x87   : > { %v360_v12 = vpop.permute.xlu1 %359  ;;  %v354_v13 = vpop.permute.xlu0 %353 }
  0x88   : > { %v371_v15 = vcombine.low %v348_v0, %v360_v12 }
  0x8a   : > { %v378_v19 = vrot.slane %v371_v15, %v1425_v14 }
  0x8b   : > { %v366_v17 = vpop.permute.xlu1 %365  ;;  %v363_v18 = vpop.permute.xlu0 %362 }
  0x8c   : > { %v379_v20 = vcombine.low %v354_v13, %v366_v17  ;;  %v405_v23 = vcombine.low %v351_v7, %v363_v18 }
  0x8e   : > { %v386_v22 = vrot.slane %v379_v20, %v1425_v14  ;;  %v412_v35 = vrot.slane %v405_v23, %v1425_v14 }
  0x8f   : > { %v369_v24 = vpop.permute.xlu0 %368  ;;  %v201_v25 = vpop.permute.xlu1 %200 }
  0x90   : > { %v387_v27 = vcombine.low %v378_v19, %v386_v22  ;;  %v388_v28 = vcombine.high %v378_v19, %v386_v22  ;;  %v413_v29 = vcombine.low %v357_v6, %v369_v24  ;;  %v210_v30 = vshrl.u32 %v201_v25, 16 }
  0x91   : > { %v208_v34 = vpack.i.b16 %v201_v25, %v198_v1 }
  0x92   : > { %v395_v31 = vrot.slane %v387_v27, %v1429_v21  ;;  %v402_v32 = vrot.slane %v388_v28, %v1429_v21  ;;  %v420_v33 = vrot.slane %v413_v29, %v1425_v14  ;;  %v211_v36 = vpack.i.b16 %v210_v30, %v209_v26 }
  0x93   : > { %v203_v37 = vpop.permute.xlu0 %202  ;;  %v205_v38 = vpop.permute.xlu1 %204  ;;  %v225_v46 = vrot.slane %v208_v34, %v1425_v14 }
  0x94   : > { %v403_v40 = vcombine.high %v395_v31, %v1371_v39  ;;  %v404_v41 = vcombine.high %v402_v32, %v1371_v39  ;;  %v421_v42 = vcombine.low %v412_v35, %v420_v33  ;;  %v422_v43 = vcombine.high %v412_v35, %v420_v33 }
  0x95   : > { %v215_v44 = vshrl.u32 %v203_v37, 16  ;;  %v443_v45 = vshrl.u32 %v395_v31, 16  ;;  %v214_v47 = vpack.i.b16 %v205_v38, %v203_v37  ;;  %v216_v48 = vshrl.u32 %v205_v38, 16 }
  0x96   : > { %v459_v49 = vshrl.u32 %v402_v32, 16  ;;  %v429_v50 = vrot.slane %v421_v42, %v1429_v21  ;;  %v436_v51 = vrot.slane %v422_v43, %v1429_v21  ;;  %v259_v52 = vrot.slane %v211_v36, %v1425_v14 }
  0x97   : > { %v451_v53 = vshrl.u32 %v403_v40, 16  ;;  %v467_v54 = vshrl.u32 %v404_v41, 16  ;;  %v217_v55 = vpack.i.b16 %v216_v48, %v215_v44  ;;  %v233_v56 = vrot.slane %v214_v47, %v1425_v14 }
  0x98   : > { %v437_v57 = vcombine.high %v429_v50, %v1371_v39  ;;  %v438_v58 = vcombine.high %v436_v51, %v1371_v39  ;;  %v441_v59 = vpack.i.b16 %v429_v50, %v395_v31  ;;  %v444_v60 = vshrl.u32 %v429_v50, 16 }
  0x99   : > { %v457_v61 = vpack.i.b16 %v436_v51, %v402_v32  ;;  %v460_v62 = vshrl.u32 %v436_v51, 16  ;;  %v234_v63 = vcombine.low %v225_v46, %v233_v56  ;;  %v235_v0 = vcombine.high %v225_v46, %v233_v56 }
  0x9a   : > { %v445_v1 = vpack.i.b16 %v444_v60, %v443_v45  ;;  %v449_v3 = vpack.i.b16 %v437_v57, %v403_v40  ;;  %v452_v4 = vshrl.u32 %v437_v57, 16  ;;  %v465_v5 = vpack.i.b16 %v438_v58, %v404_v41 }
  0x9b   : > { %v461_v6 = vpack.i.b16 %v460_v62, %v459_v49  ;;  %v468_v7 = vshrl.u32 %v438_v58, 16  ;;  %v242_v8 = vrot.slane %v234_v63, %v1429_v21  ;;  %v249_v10 = vrot.slane %v235_v0, %v1429_v21 }
  0x9c   : > { %v267_v11 = vrot.slane %v217_v55, %v1425_v14  ;;  %v453_v12 = vpack.i.b16 %v452_v4, %v451_v53  ;;  %v471_v13 = vcombine.low %v441_v59, %v457_v61  ;;  %v479_v15 = vcombine.low %v449_v3, %v465_v5 }
  0x9d   : > { %v286_v16 = vcombine.low %v242_v8, %v249_v10  ;;  %v1235_v17 = vcombine.high %v242_v8, %v249_v10  ;;  %v469_v18 = vpack.i.b16 %v468_v7, %v467_v54  ;;  %v505_v19 = vcombine.low %v445_v1, %v461_v6 }
  0x9e   : > { %v268_v20 = vcombine.low %v259_v52, %v267_v11  ;;  %v269_v22 = vcombine.high %v259_v52, %v267_v11  ;;  %v478_v23 = vrot.slane %v471_v13, %v1425_v14  ;;  %v486_v24 = vrot.slane %v479_v15, %v1425_v14 }
  0x9f   : > { %v293_v25 = vrot.slane %v286_v16, %v1425_v14  ;;  %v513_v26 = vcombine.low %v453_v12, %v469_v18  ;;  %v301_v29 = vrot.slane %v1235_v17, %v1425_v14  ;;  %v512_v31 = vrot.slane %v505_v19, %v1425_v14 }
  0xa0   : > { %v276_v27 = vrot.slane %v268_v20, %v1429_v21  ;;  %v283_v28 = vrot.slane %v269_v22, %v1429_v21  ;;  %v487_v30 = vcombine.low %v478_v23, %v486_v24  ;;  %v488_v33 = vcombine.high %v478_v23, %v486_v24 }
  0xa1   : > { %v520_v32 = vrot.slane %v513_v26, %v1425_v14  ;;  %v302_v40 = vcombine.low %v293_v25, %v301_v29 }
  0xa2   : > { %v311_v34 = vcombine.low %v276_v27, %v283_v28  ;;  %v1236_v35 = vcombine.high %v276_v27, %v283_v28  ;;  %v495_v36 = vrot.slane %v487_v30, %v1429_v21  ;;  %v502_v44 = vrot.slane %v488_v33, %v1429_v21  ;;  %v752_v27 = vld [vmem:[%s192_s30] sm:$0x1] }
  0xa3   : > { %v521_v37 = vcombine.low %v512_v31, %v520_v32  ;;  %v522_v38 = vcombine.high %v512_v31, %v520_v32  ;;  %v309_v51 = vrot.slane %v302_v40, %v1429_v21  ;;  %vm753_vm3 = vcmp.gt.f32.partialorder %v752_v27, 0.5 }
  0xa4   : > { %v318_v41 = vrot.slane %v311_v34, %v1425_v14  ;;  %v326_v42 = vrot.slane %v1236_v35, %v1425_v14  ;;  %v542_v48 = vshrl.u32 %v495_v36, 16  ;;  %v503_v52 = vcombine.high %v495_v36, %v1371_v39 }
  0xa5   : > { %v529_v43 = vrot.slane %v521_v37, %v1429_v21  ;;  %v536_v45 = vrot.slane %v522_v38, %v1429_v21  ;;  %v504_v57 = vcombine.high %v502_v44, %v1371_v39  ;;  %v339_v60 = vshrl.u32 %v309_v51, 16 }
  0xa6   : > { %v327_v46 = vcombine.low %v318_v41, %v326_v42  ;;  %v548_v61 = vshrl.u32 %v503_v52, 16  ;;  %v310_v8 = vcombine.high %v309_v51, %v1371_v39  ;;  %v554_v20 = vshrl.u32 %v502_v44, 16 }
  0xa7   : > { %v541_v47 = vpack.i.b16 %v529_v43, %v495_v36  ;;  %v543_v49 = vshrl.u32 %v529_v43, 16  ;;  %v537_v50 = vcombine.high %v529_v43, %v1371_v39  ;;  %v538_v53 = vcombine.high %v536_v45, %v1371_v39 }
  0xa8   : > { %v334_v56 = vrot.slane %v327_v46, %v1429_v21  ;;  %v560_v1 = vshrl.u32 %v504_v57, 16  ;;  %v555_v16 = vshrl.u32 %v536_v45, 16  ;;  %v553_v17 = vpack.i.b16 %v536_v45, %v502_v44 }
  0xa9   : > { %v568_v54 = vsel %vm563_vm1, %v541_v47, 0  ;;  %v544_v55 = vpack.i.b16 %v543_v49, %v542_v48  ;;  %v549_v59 = vshrl.u32 %v537_v50, 16  ;;  %v559_v62 = vpack.i.b16 %v538_v53, %v504_v57 }
  0xaa   : > { %1266 = vmatpush3.bf16.xpose.msra.mxu0 %v568_v54  ;;  %v547_v63 = vpack.i.b16 %v537_v50, %v503_v52  ;;  %v340_v0 = vshrl.u32 %v334_v56, 16  ;;  %v561_v3 = vshrl.u32 %v538_v53, 16  ;;  %v338_v5 = vpack.i.b16 %v334_v56, %v309_v51 }
  0xab   : > { %v614_v58 = vsel %vm563_vm1, %v544_v55, 0  ;;  %1277 = vmatprep.subr.bf16.mxu0 %v1367_v2  ;;  %v1473_v4 = vsel %vm815_vm2, %v559_v62, 0  ;;  %v550_v6 = vpack.i.b16 %v549_v59, %v548_v61  ;;  %v335_v12 = vcombine.high %v334_v56, %v1371_v39 }
  0xac   : > { %1272 = vmatpush3.bf16.xpose.msra.mxu1 %v614_v58  ;;  %v562_v7 = vpack.i.b16 %v561_v3, %v560_v1  ;;  %v660_v10 = vsel %vm563_vm1, %v547_v63, 0  ;;  %v341_v11 = vpack.i.b16 %v340_v0, %v339_v60  ;;  %v345_v18 = vshrl.u32 %v310_v8, 16 }
  0xad   : > { %1283 = vmatprep.subr.bf16.mxu1 %v1367_v2  ;;  %v706_v15 = vsel %vm563_vm1, %v550_v6, 0  ;;  %v346_v19 = vshrl.u32 %v335_v12, 16  ;;  %v344_v22 = vpack.i.b16 %v335_v12, %v310_v8  ;;  %v556_v23 = vpack.i.b16 %v555_v16, %v554_v20 }
  0xae   : > { %v1480_v13 = vsel %vm815_vm2, %v562_v7, 0  ;;  %v817_v24 = vsel %vm815_vm2, %v553_v17, 0  ;;  %v757_v28 = vsub.s32 0, %v1422_v9  ;;  %v754_v29 = vsel %vm753_vm3, 1, %v1371_v39 }
  0xaf   : > { %v347_v25 = vpack.i.b16 %v346_v19, %v345_v18  ;;  %v863_v26 = vsel %vm815_vm2, %v556_v23, 0 }
  0xb0   : > { %v758_v30 = vrot.slane %v754_v29, %v757_v28 }
  0xb1   : > { %1268 = vmatmul.mubr.msk.bf16.vlgmr.msra.gmra.mrb[0].mxu0 %vm563_vm1, %v338_v5 }
  0xb2   : > { %1278 = vmatpush3.bf16.xpose.msra.mxu0 %v660_v10  ;;  %1279 = vmatprep.mubr.msk.bf16.mxu0 %vm1368_vm0, %v1367_v2  ;;  %vm759_vm4 = vcmp.eq.s32.totalorder %v758_v30, 1 }
  0xb3   : > { %1274 = vmatmul.mubr.msk.bf16.vlgmr.msra.gmra.mrb[0].mxu1 %vm563_vm1, %v341_v11  ;;  %1289 = vmatprep.subr.bf16.mxu0 %v1367_v2 }
  0xb4   : > { %1284 = vmatpush3.bf16.xpose.msra.mxu1 %v706_v15  ;;  %1285 = vmatprep.mubr.msk.bf16.mxu1 %vm1368_vm0, %v1367_v2 }
  0xb5   : > { %1295 = vmatprep.subr.bf16.mxu1 %v1367_v2 }
  0xb9   : > { %1280 = vmatmul.mubr.msk.bf16.vlgmr.msra.gmra.mrb[4].mxu0 %vm563_vm1, %v344_v22 }
  0xba   : > { %1290 = vmatpush3.bf16.msra.mxu0 %v817_v24  ;;  %1291 = vmatprep.mubr.msk.bf16.mxu0 %vm1368_vm0, %v1367_v2 }
  0xbb   : > { %1286 = vmatmul.mubr.msk.bf16.vlgmr.msra.gmra.mrb[4].mxu1 %vm563_vm1, %v347_v25  ;;  %1301 = vmatprep.subr.bf16.mxu0 %v1367_v2 }
  0xbc   : > { %1296 = vmatpush3.bf16.msra.mxu1 %v863_v26  ;;  %1297 = vmatprep.mubr.msk.bf16.mxu1 %vm1368_vm0, %v1367_v2 }
  0xbd   : > { %1307 = vmatprep.subr.bf16.mxu1 %v1367_v2 }
 0x184   : > { %v604_v31 = vpop.f32.mrb[0].mxu0 }
 0x185   : > { %v748_v32 = vmul.f32 0.35355338, %v604_v31  ;;  %v1269_v33 = vpop.f32.mrb[1].mxu0 }
 0x186   : > { %v607_v34 = vpop.f32.mrb[2].mxu0  ;;  %v650_v35 = vpop.f32.mrb[0].mxu1 }
 0x187   : > { %v749_v36 = vmul.f32 0.35355338, %v650_v35  ;;  %v1270_v37 = vpop.f32.mrb[3].mxu0  ;;  %v1275_v38 = vpop.f32.mrb[1].mxu1  ;;  %v760_v40 = vsel %vm759_vm4, -1e+30, %v748_v32 }
 0x188   : > { %v653_v41 = vpop.f32.mrb[2].mxu1  ;;  %v764_v42 = vsel %vm563_vm1, %v760_v40, -inf }
 0x189   : > { %v1276_v43 = vpop.f32.mrb[3].mxu1  ;;  %765 = vmax.xlane.f32.xlu0 %v764_v42  ;;  %v761_v9 = vsel %vm759_vm4, -1e+30, %v749_v36 }
 0x18a   : > { %v767_v39 = vsel %vm563_vm1, %v761_v9, -inf }
 0x18b   : > { %768 = vmax.xlane.f32.xlu1 %v767_v39 }
 0x18c   : > { %v696_v44 = vpop.f32.mrb[4].mxu0 }
 0x18d   : > { %v750_v45 = vmul.f32 0.35355338, %v696_v44  ;;  %v1281_v46 = vpop.f32.mrb[5].mxu0 }
 0x18e   : > { %v699_v47 = vpop.f32.mrb[6].mxu0  ;;  %v742_v48 = vpop.f32.mrb[4].mxu1 }
 0x18f   : > { %v751_v49 = vmul.f32 0.35355338, %v742_v48  ;;  %v1282_v50 = vpop.f32.mrb[7].mxu0  ;;  %v1287_v51 = vpop.f32.mrb[5].mxu1  ;;  %v762_v52 = vsel %vm759_vm4, -1e+30, %v750_v45 }
 0x190   : > { %v745_v53 = vpop.f32.mrb[6].mxu1  ;;  %v770_v54 = vsel %vm563_vm1, %v762_v52, -inf }
 0x191   : > { %v1288_v55 = vpop.f32.mrb[7].mxu1  ;;  %771 = vmax.xlane.f32.xlu0 %v770_v54  ;;  %v763_v56 = vsel %vm759_vm4, -1e+30, %v751_v49 }
 0x192   : > { %v773_v57 = vsel %vm563_vm1, %v763_v56, -inf }
 0x195   : > { %774 = vmax.xlane.f32.xlu0 %v773_v57 }
 0x216   : > { %v766_v58 = vpop.xlane.xlu0 %765 }
 0x217   : > { %v776_v59 = vsub.f32 %v760_v40, %v766_v58 }
 0x218   : > { %v769_v60 = vpop.xlane.xlu1 %768 }
 0x219   : > { %v780_v61 = vmul.f32 1.442695, %v776_v59  ;;  %v777_v62 = vsub.f32 %v761_v9, %v769_v60 }
 0x21b   : > { %1336 = vpow2.f32 %v780_v61  ;;  %v782_v63 = vmul.f32 1.442695, %v777_v62 }
 0x21d   : > { %1338 = vpow2.f32 %v782_v63 }
 0x21e   : > { %v772_v0 = vpop.xlane.xlu0 %771 }
 0x21f   : > { %v778_v1 = vsub.f32 %v762_v52, %v772_v0 }
 0x221   : > { %v784_v3 = vmul.f32 1.442695, %v778_v1 }
 0x222   : > { %v775_v5 = vpop.xlane.xlu0 %774 }
 0x223   : > { %1340 = vpow2.f32 %v784_v3  ;;  %v779_v6 = vsub.f32 %v763_v56, %v775_v5 }
 0x225   : > { %v1337_v7 = vpop.eup %1336  ;;  %v786_v8 = vmul.f32 1.442695, %v779_v6 }
 0x226   : > { %v788_v10 = vsel %vm563_vm1, %v1337_v7, 0.0 }
 0x227   : > { %v1339_v11 = vpop.eup %1338  ;;  %1342 = vpow2.f32 %v786_v8  ;;  %789 = vadd.xlane.f32.xlu1 %v788_v10 }
 0x228   : > { %v791_v12 = vsel %vm563_vm1, %v1339_v11, 0.0 }
 0x229   : > { %792 = vadd.xlane.f32.xlu0 %v791_v12 }
 0x22d   : > { %v1341_v15 = vpop.eup %1340 }
 0x22e   : > { %v794_v16 = vsel %vm563_vm1, %v1341_v15, 0.0 }
 0x22f   : > { %795 = vadd.xlane.f32.xlu1 %v794_v16 }
 0x231   : > { %v1343_v17 = vpop.eup %1342 }
 0x232   : > { %v797_v18 = vsel %vm563_vm1, %v1343_v17, 0.0 }
 0x233   : > { %798 = vadd.xlane.f32.xlu0 %v797_v18 }
 0x2b4   : > { %v790_v19 = vpop.xlane.xlu1 %789 }
 0x2b5   : > { %1344 = vrcp.f32 %v790_v19 }
 0x2b6   : > { %v793_v20 = vpop.xlane.xlu0 %792 }
 0x2b7   : > { %1346 = vrcp.f32 %v793_v20 }
 0x2bc   : > { %v796_v22 = vpop.xlane.xlu1 %795 }
 0x2bd   : > { %1348 = vrcp.f32 %v796_v22 }
 0x2bf   : > { %v1345_v23 = vpop.eup %1344 }
 0x2c0   : > { %v804_v24 = vmul.f32 %v1345_v23, %v1337_v7  ;;  %v799_v25 = vpop.xlane.xlu0 %798 }
 0x2c1   : > { %v1347_v26 = vpop.eup %1346  ;;  %1350 = vrcp.f32 %v799_v25 }
 0x2c2   : > { %v805_v27 = vmul.f32 %v1347_v26, %v1339_v11  ;;  %v808_v28 = vpack.c.bf16 %v804_v24, %v804_v24 }
 0x2c4   : > { %1292 = vmatmul.mubr.msk.bf16.vlgmr.msra.gmra.mrb[8].mxu0 %vm563_vm1, %v808_v28  ;;  %v809_v29 = vpack.c.bf16 %v805_v27, %v805_v27 }
 0x2c5   : > { %1302 = vmatpush3.bf16.msra.mxu0 %v1473_v4  ;;  %1303 = vmatprep.mubr.msk.bf16.mxu0 %vm1368_vm0, %v1367_v2 }
 0x2c6   : > { %1298 = vmatmul.mubr.msk.bf16.vlgmr.msra.gmra.mrb[8].mxu1 %vm563_vm1, %v809_v29 }
 0x2c7   : > { %v1349_v30 = vpop.eup %1348  ;;  %1308 = vmatpush3.bf16.msra.mxu1 %v1480_v13  ;;  %1309 = vmatprep.mubr.msk.bf16.mxu1 %vm1368_vm0, %v1367_v2 }
 0x2c8   : > { %v806_v31 = vmul.f32 %v1349_v30, %v1341_v15 }
 0x2ca   : > { %v810_v32 = vpack.c.bf16 %v806_v31, %v806_v31 }
 0x2cb   : > { %v1351_v33 = vpop.eup %1350 }
 0x2cc   : > { %v807_v34 = vmul.f32 %v1351_v33, %v1343_v17  ;;  %1304 = vmatmul.mubr.msk.bf16.vlgmr.msra.gmra.mrb[12].mxu0 %vm563_vm1, %v810_v32 }
 0x2ce   : > { %v811_v35 = vpack.c.bf16 %v807_v34, %v807_v34 }
 0x2d0   : > { %1310 = vmatmul.mubr.msk.bf16.vlgmr.msra.gmra.mrb[12].mxu1 %vm563_vm1, %v811_v35 }
 0x397   : > { %v853_v4 = vpop.f32.mrb[8].mxu0 }
 0x398   : > { %v1293_v36 = vpop.f32.mrb[9].mxu0 }
 0x399   : > { %v856_v37 = vpop.f32.mrb[10].mxu0  ;;  %v899_v38 = vpop.f32.mrb[8].mxu1 }
 0x39a   : > { %v1294_v40 = vpop.f32.mrb[11].mxu0  ;;  %v1299_v41 = vpop.f32.mrb[9].mxu1 }
 0x39b   : > { %v902_v42 = vpop.f32.mrb[10].mxu1 }
 0x39c   : > { %v1300_v13 = vpop.f32.mrb[11].mxu1 }
 0x39f   : > { %v945_v43 = vpop.f32.mrb[12].mxu0 }
 0x3a0   : > { %v997_v9 = vcombine.low %v853_v4, %v945_v43  ;;  %v998_v2 = vcombine.high %v853_v4, %v945_v43  ;;  %v1305_v39 = vpop.f32.mrb[13].mxu0 }
 0x3a1   : > { %v948_v44 = vpop.f32.mrb[14].mxu0 }
 0x3a2   : > { %v1306_v45 = vpop.f32.mrb[15].mxu0  ;;  %v1005_v51 = vrot.slane %v997_v9, %v1425_v14  ;;  %v1012_v52 = vrot.slane %v998_v2, %v1425_v14 }
 0x3a3   : > { %v991_v46 = vpop.f32.mrb[12].mxu1 }
 0x3a4   : > { %v1013_v47 = vcombine.low %v899_v38, %v991_v46  ;;  %v1014_v48 = vcombine.high %v899_v38, %v991_v46  ;;  %v1311_v49 = vpop.f32.mrb[13].mxu1 }
 0x3a5   : > { %v994_v50 = vpop.f32.mrb[14].mxu1 }
 0x3a6   : > { %v1021_v53 = vrot.slane %v1013_v47, %v1425_v14  ;;  %v1028_v54 = vrot.slane %v1014_v48, %v1425_v14  ;;  %v1312_v55 = vpop.f32.mrb[15].mxu1 }
 0x3a8   : > { %v1029_v56 = vcombine.low %v1005_v51, %v1021_v53  ;;  %v1030_v57 = vcombine.high %v1005_v51, %v1021_v53  ;;  %v1045_v58 = vcombine.low %v1012_v52, %v1028_v54  ;;  %v1046_v59 = vcombine.high %v1012_v52, %v1028_v54 }
 0x3aa   : > { %v1037_v60 = vrot.slane %v1029_v56, %v1429_v21  ;;  %v1044_v61 = vrot.slane %v1030_v57, %v1429_v21  ;;  %v1053_v62 = vrot.slane %v1045_v58, %v1429_v21  ;;  %v1060_v63 = vrot.slane %v1046_v59, %v1429_v21 }
 0x3ac   : > { %v1065_v0 = vcombine.low %v1037_v60, %v1044_v61  ;;  %v1245_v1 = vcombine.high %v1037_v60, %v1044_v61  ;;  %v1081_v3 = vcombine.low %v1053_v62, %v1060_v63  ;;  %v1246_v5 = vcombine.high %v1053_v62, %v1060_v63 }
 0x3ae   : > { %v1072_v6 = vrot.slane %v1065_v0, %v1425_v14  ;;  %v1080_v7 = vrot.slane %v1245_v1, %v1425_v14  ;;  %v1088_v8 = vrot.slane %v1081_v3, %v1425_v14  ;;  %v1096_v10 = vrot.slane %v1246_v5, %v1425_v14 }
 0x3b0   : > { %v1098_v11 = vcombine.high %v1072_v6, %v1080_v7  ;;  %v1114_v12 = vcombine.high %v1088_v8, %v1096_v10  ;;  %v1097_v15 = vcombine.low %v1072_v6, %v1080_v7  ;;  %v1113_v16 = vcombine.low %v1088_v8, %v1096_v10 }
 0x3b2   : > { %v1112_v17 = vrot.slane %v1098_v11, %v1429_v21  ;;  %v1128_v18 = vrot.slane %v1114_v12, %v1429_v21  ;;  %v1105_v19 = vrot.slane %v1097_v15, %v1429_v21  ;;  %v1121_v20 = vrot.slane %v1113_v16, %v1429_v21 }
 0x3b4   : > { %v1131_v22 = vcombine.low %v1112_v17, %v1128_v18  ;;  %v1130_v23 = vcombine.high %v1105_v19, %v1121_v20  ;;  %v1132_v24 = vcombine.high %v1112_v17, %v1128_v18  ;;  %v1129_v25 = vcombine.low %v1105_v19, %v1121_v20 }
 0x3b6   : > { %1138 = vrot.lane.b32.xlu0 %v1131_v22, %s1372_s4  ;;  %1134 = vrot.lane.b32.xlu1 %v1130_v23, %s1373_s5 }
 0x3ba   : > { %1142 = vrot.lane.b32.xlu1 %v1132_v24, %s1374_s6 }
 0x428   : > { %v1135_v14 = vpop.permute.xlu1 %1134  ;;  %v1139_v26 = vpop.permute.xlu0 %1138 }
 0x429   : > { %v1145_v27 = vsel %vm563_vm1, %v1129_v25, %v1135_v14 }
 0x42a   : > { %v1147_v29 = vsel %vm1146_vm5, %v1145_v27, %v1139_v26 }
 0x42c   : > { %v1143_v28 = vpop.permute.xlu1 %1142 }
 0x42d   : > { %v1149_v21 = vsel %vm1148_vm6, %v1147_v29, %v1143_v28 }
 0x42e   : > { %v1150_v30 = vpack.c.bf16 %v1149_v21, %v1149_v21 }
 0x430   : > { %1152 = vst.msk [vmem:[%s196_s9] sm:$0xf] %vm1151_vm7, %v1150_v30 }
 0x431 PF: > { %s13_s12 = sadd.s32 1, %s1358_s12  }
 0x432   : > { %p10_p4 = scmp.ge.s32.totalorder %s13_s12, 4  }
 0x434   :  { %12 = sbr.rel (!%p10_p4) target bundleno = 1 (0x1), region = 68 }

</bundles_post_ra>
